<compile_context>
chip_gen: v7x
topology: tpu7x:2x2x1
jax: 0.10.0
libtpu: 0.0.40
codegen_flags: <defaults>
</compile_context>

<pallas_src>
import math

import numpy as np

import jax
import jax.numpy as jnp
from jax.experimental import pallas as pl
from jax.experimental import pallas as _pl_unused  # keep namespace explicit
from jax.experimental.pallas import tpu as pltpu   # noqa: F401  (not required here)

# ---------------- configuration (matches the module) --------------------------
INPUT_DIM = 16
EMBED_DIM = 128
NUM_HEADS = 4
SEQ_LEN = 8
BATCH = 1                                    # required by q.squeeze() semantics

HEAD_DIM = EMBED_DIM // NUM_HEADS            # inner nn.MultiheadAttention embed dim (32)
INNER_HEADS = NUM_HEADS                      # inner attention num_heads (4)
INNER_HEAD_DIM = HEAD_DIM // INNER_HEADS     # per-head dim inside inner attention (8)

# ---------------- packed parameter-slab layout (rows of a (480,128) f32 slab) -
R_WCOMB = 0        # 4 x (16, 96)  folded per-head [qkv_proj @ in_proj] weights
R_BCOMB = 64       # 4 x (1, 96)   folded per-head biases
R_QMASK = 72       # 4 x (1, 32)   per-head q lane mask, 1/sqrt(8) folded in
R_VMASK = 76       # 4 x (1, 32)   per-head v lane mask
R_BIAS = 80        # (32, 32)      additive cross-batch mask (0 / -1e30)
R_WOUT = 112       # (32, 32)      inner out_proj^T
R_BOUT = 144       # (1, 32)       inner out_proj bias
R_SEL = 152        # (32, 32)      row-regroup selection matrices (4 stacked (8,32))
R_WO = 184         # 2 x (128,128) o_proj^T split into two lane halves
R_BO = 440         # 2 x (1, 128)  o_proj bias split into two lane halves
R_BLK = 448        # (32, 128)     head-average matrix (1/INNER_HEADS folded in)
SLAB_ROWS = 480


# ---------------- the single fused Pallas kernel ------------------------------
def _fused_encoder_kernel(x_ref, p_ref, o_ref, amap_ref):
    f32 = jnp.float32
    hd = HEAD_DIM                                                    # 32

    x = x_ref[...]                                                   # (8, 16)

    # (1) qkv_proj + head regroup + inner in-projection, folded into 4 per-head
    #     matmuls.  Row r = l*SEQ_LEN + n ; cols = [qp | kp | vp] (32 each).
    chunks = []
    for l in range(NUM_HEADS):
        w_l = p_ref[R_WCOMB + 16 * l:R_WCOMB + 16 * (l + 1), 0:96]   # (16, 96)
        b_l = p_ref[R_BCOMB + l:R_BCOMB + l + 1, 0:96]               # (1, 96)
        chunks.append(jnp.dot(x, w_l, preferred_element_type=f32) + b_l)
    qkvp = jnp.concatenate(chunks, axis=0)                           # (32, 96)

    qp = qkvp[:, 0:hd]                                               # (32, 32)
    kp = qkvp[:, hd:2 * hd]                                          # (32, 32)
    vp = qkvp[:, 2 * hd:3 * hd]                                      # (32, 32)

    # (2) inner attention for all (n, inner-head) pairs.  The 4 inner heads are
    #     stacked along sublanes -> ONE score matmul, ONE softmax, ONE PV matmul.
    bias = p_ref[R_BIAS:R_BIAS + 32, 0:hd]                           # (32,32) 0 / -1e30
    q_stack = jnp.concatenate(
        [qp * p_ref[R_QMASK + hi:R_QMASK + hi + 1, 0:hd]             # scale folded in mask
         for hi in range(INNER_HEADS)], axis=0)                      # (128, 32)
    sc = jnp.einsum("rd,cd->rc", q_stack, kp,
                    preferred_element_type=f32)                      # (128, 32)
    sc = sc + jnp.concatenate([bias] * INNER_HEADS, axis=0)
    sc = sc - jnp.max(sc, axis=-1, keepdims=True)
    ex = jnp.exp(sc)
    prob = ex * pl.reciprocal(jnp.sum(ex, axis=-1, keepdims=True), approx=True)
    pv = jnp.dot(prob, vp, preferred_element_type=f32)               # (128, 32)

    attn = jnp.zeros((32, hd), f32)
    amap = jnp.zeros((32, hd), f32)
    for hi in range(INNER_HEADS):                                    # static, unrolled
        vm = p_ref[R_VMASK + hi:R_VMASK + hi + 1, 0:hd]              # (1, 32) head lanes
        attn = attn + pv[hi * 32:(hi + 1) * 32, :] * vm
        amap = amap + prob[hi * 32:(hi + 1) * 32, :]

    # (3) inner out_proj ---------------------------------------------------------
    values = (jnp.dot(attn, p_ref[R_WOUT:R_WOUT + 32, 0:hd],
                      preferred_element_type=f32)
              + p_ref[R_BOUT:R_BOUT + 1, 0:hd])                      # (32, 32)

    # (4) values.reshape(batch, seq, embed_dim): output row s gathers rows 4s..4s+3
    #     of `values`, done with constant selection matmuls from the slab.
    values_se = jnp.concatenate(
        [jnp.dot(p_ref[R_SEL + 8 * m:R_SEL + 8 * (m + 1), 0:32], values,
                 preferred_element_type=f32) for m in range(4)], axis=1)  # (8, 128)

    # (5) o_proj: two aligned, lane-dense (8, 128) stores ------------------------
    o_ref[:, 0:128] = (jnp.dot(values_se, p_ref[R_WO:R_WO + 128, :],
                               preferred_element_type=f32)
                       + p_ref[R_BO:R_BO + 1, :])
    o_ref[:, 128:256] = (jnp.dot(values_se, p_ref[R_WO + 128:R_WO + 256, :],
                                 preferred_element_type=f32)
                         + p_ref[R_BO + 1:R_BO + 2, :])

    # (6) attention map averaged over inner heads (1/4 folded into the constant);
    #     lane-dense (32, 128) store, wrapper keeps cols 0..3.
    amap_ref[...] = jnp.dot(amap, p_ref[R_BLK:R_BLK + 32, :],
                            preferred_element_type=f32)


def fused_encoder_call(x2d, slab):
    """One pallas_call, empty grid, two input DMAs, lane-dense outputs."""
    S = x2d.shape[0]
    flops = 2 * (4 * S * INPUT_DIM * 96        # folded in-proj
                 + 2 * 128 * 32 * 32           # scores + PV
                 + 32 * 32 * 32                # inner out_proj
                 + 4 * S * 32 * 32             # row regroup
                 + 2 * S * 128 * 128           # o_proj
                 + 32 * 32 * 128)              # attention-map head sum
    bytes_accessed = (SLAB_ROWS * 128 + S * INPUT_DIM
                      + S * 2 * EMBED_DIM + NUM_HEADS * S * 128) * 4
    return pl.pallas_call(
        _fused_encoder_kernel,
        out_shape=(
            jax.ShapeDtypeStruct((S, 2 * EMBED_DIM), jnp.float32),          # o_proj out
            jax.ShapeDtypeStruct((NUM_HEADS * S, 128), jnp.float32),        # attn map slab
        ),
        cost_estimate=pl.CostEstimate(flops=flops,
                                      transcendentals=128 * 32 + 128,
                                      bytes_accessed=bytes_accessed),
    )(x2d, slab)


# ---------------- forward (mirrors MultiheadAttentionEncoder.forward) ---------
@jax.jit
def forward(x, slab):
    B, S, _ = x.shape
    assert B == 1, "q.squeeze() in the torch forward implies batch == 1"
    o2d, am = fused_encoder_call(x.reshape(S, INPUT_DIM), slab)
    o = o2d.reshape(B, S, 2 * EMBED_DIM)
    # am rows are (l*S + n); keep cols 0..3 and rearrange to torch's (N, L, L)
    att_map = am[:, :NUM_HEADS].reshape(NUM_HEADS, S, NUM_HEADS).transpose(1, 0, 2)
    return o, att_map


# ---------------- one-time parameter packing (host side, not jitted per call) -
def pack_params(params):
    w_qkv = np.asarray(params["w_qkv"], np.float64)   # (16, 384)
    b_qkv = np.asarray(params["b_qkv"], np.float64)   # (1, 384)
    w_in = np.asarray(params["w_in"], np.float64)     # (32, 96)  inner in_proj^T
    b_in = np.asarray(params["b_in"], np.float64)     # (1, 96)
    w_out = np.asarray(params["w_out"], np.float32)   # (32, 32)  inner out_proj^T
    b_out = np.asarray(params["b_out"], np.float32)   # (1, 32)
    w_o = np.asarray(params["w_o"], np.float32)       # (128, 256) o_proj^T
    b_o = np.asarray(params["b_o"], np.float32)       # (1, 256)

    wq, wk, wv = w_in[:, 0:32], w_in[:, 32:64], w_in[:, 64:96]

    slab = np.zeros((SLAB_ROWS, 128), np.float32)

    # folded per-head weights / biases:  qkv_proj head-block @ inner in-proj
    for l in range(NUM_HEADS):
        wl = np.concatenate([w_qkv[:, l * 96 + 0:l * 96 + 32] @ wq,
                             w_qkv[:, l * 96 + 32:l * 96 + 64] @ wk,
                             w_qkv[:, l * 96 + 64:l * 96 + 96] @ wv], axis=1)
        bl = np.concatenate([b_qkv[:, l * 96 + 0:l * 96 + 32] @ wq,
                             b_qkv[:, l * 96 + 32:l * 96 + 64] @ wk,
                             b_qkv[:, l * 96 + 64:l * 96 + 96] @ wv], axis=1) + b_in
        slab[R_WCOMB + 16 * l:R_WCOMB + 16 * (l + 1), :96] = wl.astype(np.float32)
        slab[R_BCOMB + l, :96] = bl[0].astype(np.float32)

    # per-head lane masks (softmax scale folded into the q mask)
    scale = 1.0 / math.sqrt(INNER_HEAD_DIM)
    for hi in range(INNER_HEADS):
        slab[R_QMASK + hi, hi * 8:(hi + 1) * 8] = scale
        slab[R_VMASK + hi, hi * 8:(hi + 1) * 8] = 1.0

    # additive cross-batch mask: row r=(l*8+n), col c=(m*8+n'); keep n'==n only
    r = np.arange(32)
    same_n = (r[:, None] % SEQ_LEN) == (r[None, :] % SEQ_LEN)
    slab[R_BIAS:R_BIAS + 32, :32] = np.where(same_n, 0.0, -1e30).astype(np.float32)

    slab[R_WOUT:R_WOUT + 32, :32] = w_out
    slab[R_BOUT, :32] = b_out[0]

    # row-regroup selection: Sel_m[s, r] = 1  iff  r == 4*s + m
    for m in range(4):
        for s in range(SEQ_LEN):
            slab[R_SEL + 8 * m + s, 4 * s + m] = 1.0

    slab[R_WO:R_WO + 128, :] = w_o[:, :128]
    slab[R_WO + 128:R_WO + 256, :] = w_o[:, 128:]
    slab[R_BO, :] = b_o[0, :128]
    slab[R_BO + 1, :] = b_o[0, 128:]

    # attention-map head sum, 1/INNER_HEADS folded in, widened to 128 lanes
    for c in range(32):
        slab[R_BLK + c, c // SEQ_LEN] = 1.0 / INNER_HEADS

    return jnp.asarray(slab)


# ---------------- pure-JAX reference (correctness check only) -----------------
def reference_forward(x, params):
    B, S, _ = x.shape
    E, nh, hd = EMBED_DIM, NUM_HEADS, HEAD_DIM
    nhi, hdi = INNER_HEADS, INNER_HEAD_DIM
    hp = jax.lax.Precision.HIGHEST

    qkv = jnp.dot(x[0], params["w_qkv"], precision=hp) + params["b_qkv"]   # (S, 3E)
    qkv = qkv.reshape(S, nh, 3 * hd).transpose(1, 0, 2)                    # (L, N, 3hd)
    q, k, v = jnp.split(qkv, 3, axis=-1)

    wq, wk, wv = jnp.split(params["w_in"], 3, axis=1)
    bq, bk, bv = jnp.split(params["b_in"], 3, axis=1)
    qp = jnp.einsum("lnh,ho->lno", q, wq, precision=hp) + bq
    kp = jnp.einsum("lnh,ho->lno", k, wk, precision=hp) + bk
    vp = jnp.einsum("lnh,ho->lno", v, wv, precision=hp) + bv

    def split_heads(t):                                   # (L,N,hd) -> (N*nhi, L, hdi)
        return t.reshape(nh, S * nhi, hdi).transpose(1, 0, 2)

    qh, kh, vh = split_heads(qp), split_heads(kp), split_heads(vp)
    s = jnp.einsum("bld,bmd->blm", qh / math.sqrt(hdi), kh, precision=hp)
    prob = jax.nn.softmax(s, axis=-1)                     # (N*nhi, L, L)
    out = jnp.einsum("blm,bmd->bld", prob, vh, precision=hp)
    merged = out.transpose(1, 0, 2).reshape(nh * S, hd)   # (L*N, hd)
    values = jnp.dot(merged, params["w_out"], precision=hp) + params["b_out"]
    values = values.reshape(B, S, E)                      # raw reshape, as in the torch code
    o = jnp.einsum("bse,eo->bso", values, params["w_o"], precision=hp) + params["b_o"]
    att_map = prob.reshape(S, nhi, nh, nh).mean(axis=1)   # (N, L, L)
    return o, att_map


# ---------------- parameters (deterministic, shapes from the module) ----------
def init_params(key):
    def xavier(k, shape):
        bound = math.sqrt(6.0 / (shape[0] + shape[1]))
        return jax.random.uniform(k, shape, jnp.float32, -bound, bound)

    ks = jax.random.split(key, 4)
    return dict(
        w_qkv=xavier(ks[0], (INPUT_DIM, 3 * EMBED_DIM)),
        b_qkv=jnp.zeros((1, 3 * EMBED_DIM), jnp.float32),
        w_in=xavier(ks[1], (HEAD_DIM, 3 * HEAD_DIM)),      # inner in_proj_weight^T
        b_in=jnp.zeros((1, 3 * HEAD_DIM), jnp.float32),
        w_out=xavier(ks[2], (HEAD_DIM, HEAD_DIM)),         # inner out_proj^T
        b_out=jnp.zeros((1, HEAD_DIM), jnp.float32),
        w_o=xavier(ks[3], (EMBED_DIM, 2 * EMBED_DIM)),     # o_proj^T
        b_o=jnp.zeros((1, 2 * EMBED_DIM), jnp.float32),
    )


# ---------------- main ---------------------------------------------------------
if __name__ == "__main__":
    key = jax.random.PRNGKey(0)
    pkey, xkey = jax.random.split(key)
    params = init_params(pkey)
    slab = pack_params(params)                             # packed ONCE, reused per call
    x = jax.random.normal(xkey, (BATCH, SEQ_LEN, INPUT_DIM), dtype=jnp.float32)

    o, att_map = jax.block_until_ready(forward(x, slab))

    # shape checks (match the torch module's outputs)
    assert o.shape == (BATCH, SEQ_LEN, 2 * EMBED_DIM)
    assert att_map.shape == (SEQ_LEN, NUM_HEADS, NUM_HEADS)

    # numerical check against a pure-JAX reference of the same math (f32 end-to-end;
    # tolerance leaves headroom for the host-side weight fold and approx reciprocal).
    o_ref, att_ref = reference_forward(x, params)
    assert jnp.allclose(o, o_ref, atol=1e-3, rtol=1e-3), float(jnp.max(jnp.abs(o - o_ref)))
    assert jnp.allclose(att_map, att_ref, atol=1e-3, rtol=1e-3)
    # approx=True reciprocal -> ~2^-12 row-sum error, so 2e-3 instead of 1e-4
    assert jnp.allclose(att_map.sum(-1), 1.0, atol=2e-3)

    print("KERNEL_OK")
</pallas_src>

<mosaic_0001>
module attributes {stable_mosaic.version = 11 : i64} {
  func.func @_fused_encoder_kernel(%arg0: memref<8x16xf32, #tpu.memory_space<vmem>>, %arg1: memref<480x128xf32, #tpu.memory_space<vmem>>, %arg2: memref<8x256xf32, #tpu.memory_space<vmem>>, %arg3: memref<32x128xf32, #tpu.memory_space<vmem>>) attributes {dimension_semantics = [], scalar_prefetch = 0 : i64, scratch_operands = 0 : i64, tpu.core_type = #tpu.core_type<tc>} {
    %c0 = arith.constant 0 : index
    %c0_0 = arith.constant 0 : index
    %0 = vector.load %arg0[%c0, %c0_0] : memref<8x16xf32, #tpu.memory_space<vmem>>, vector<8x16xf32>
    %c0_1 = arith.constant 0 : index
    %c0_2 = arith.constant 0 : index
    %1 = vector.load %arg1[%c0_1, %c0_2] : memref<480x128xf32, #tpu.memory_space<vmem>>, vector<16x96xf32>
    %c64 = arith.constant 64 : index
    %c0_3 = arith.constant 0 : index
    %2 = vector.load %arg1[%c64, %c0_3] : memref<480x128xf32, #tpu.memory_space<vmem>>, vector<1x96xf32>
    %cst = arith.constant dense<0.000000e+00> : vector<8x96xf32>
    %3 = tpu.matmul %0, %1, %cst {dimension_numbers = #tpu.dot_dimension_numbers<[1], [0], [0], [1], [0, 0, 1, 1], [], []>} : vector<8x16xf32>, vector<16x96xf32>, vector<8x96xf32> -> vector<8x96xf32>
    %4 = vector.broadcast %2 : vector<1x96xf32> to vector<8x96xf32>
    %5 = arith.addf %3, %4 : vector<8x96xf32>
    %c16 = arith.constant 16 : index
    %c0_4 = arith.constant 0 : index
    %6 = vector.load %arg1[%c16, %c0_4] : memref<480x128xf32, #tpu.memory_space<vmem>>, vector<16x96xf32>
    %c65 = arith.constant 65 : index
    %c0_5 = arith.constant 0 : index
    %7 = vector.load %arg1[%c65, %c0_5] : memref<480x128xf32, #tpu.memory_space<vmem>>, vector<1x96xf32>
    %cst_6 = arith.constant dense<0.000000e+00> : vector<8x96xf32>
    %8 = tpu.matmul %0, %6, %cst_6 {dimension_numbers = #tpu.dot_dimension_numbers<[1], [0], [0], [1], [0, 0, 1, 1], [], []>} : vector<8x16xf32>, vector<16x96xf32>, vector<8x96xf32> -> vector<8x96xf32>
    %9 = vector.broadcast %7 : vector<1x96xf32> to vector<8x96xf32>
    %10 = arith.addf %8, %9 : vector<8x96xf32>
    %c32 = arith.constant 32 : index
    %c0_7 = arith.constant 0 : index
    %11 = vector.load %arg1[%c32, %c0_7] : memref<480x128xf32, #tpu.memory_space<vmem>>, vector<16x96xf32>
    %c66 = arith.constant 66 : index
    %c0_8 = arith.constant 0 : index
    %12 = vector.load %arg1[%c66, %c0_8] : memref<480x128xf32, #tpu.memory_space<vmem>>, vector<1x96xf32>
    %cst_9 = arith.constant dense<0.000000e+00> : vector<8x96xf32>
    %13 = tpu.matmul %0, %11, %cst_9 {dimension_numbers = #tpu.dot_dimension_numbers<[1], [0], [0], [1], [0, 0, 1, 1], [], []>} : vector<8x16xf32>, vector<16x96xf32>, vector<8x96xf32> -> vector<8x96xf32>
    %14 = vector.broadcast %12 : vector<1x96xf32> to vector<8x96xf32>
    %15 = arith.addf %13, %14 : vector<8x96xf32>
    %c48 = arith.constant 48 : index
    %c0_10 = arith.constant 0 : index
    %16 = vector.load %arg1[%c48, %c0_10] : memref<480x128xf32, #tpu.memory_space<vmem>>, vector<16x96xf32>
    %c67 = arith.constant 67 : index
    %c0_11 = arith.constant 0 : index
    %17 = vector.load %arg1[%c67, %c0_11] : memref<480x128xf32, #tpu.memory_space<vmem>>, vector<1x96xf32>
    %cst_12 = arith.constant dense<0.000000e+00> : vector<8x96xf32>
    %18 = tpu.matmul %0, %16, %cst_12 {dimension_numbers = #tpu.dot_dimension_numbers<[1], [0], [0], [1], [0, 0, 1, 1], [], []>} : vector<8x16xf32>, vector<16x96xf32>, vector<8x96xf32> -> vector<8x96xf32>
    %19 = vector.broadcast %17 : vector<1x96xf32> to vector<8x96xf32>
    %20 = arith.addf %18, %19 : vector<8x96xf32>
    %21 = tpu.concatenate %5, %10, %15, %20 in 0 : vector<8x96xf32>, vector<8x96xf32>, vector<8x96xf32>, vector<8x96xf32> -> vector<32x96xf32>
    %22 = vector.extract_strided_slice %21 {offsets = [0, 0], sizes = [32, 32], strides = [1, 1]} : vector<32x96xf32> to vector<32x32xf32>
    %23 = vector.extract_strided_slice %21 {offsets = [0, 32], sizes = [32, 32], strides = [1, 1]} : vector<32x96xf32> to vector<32x32xf32>
    %24 = vector.extract_strided_slice %21 {offsets = [0, 64], sizes = [32, 32], strides = [1, 1]} : vector<32x96xf32> to vector<32x32xf32>
    %c80 = arith.constant 80 : index
    %c0_13 = arith.constant 0 : index
    %25 = vector.load %arg1[%c80, %c0_13] : memref<480x128xf32, #tpu.memory_space<vmem>>, vector<32x32xf32>
    %c72 = arith.constant 72 : index
    %c0_14 = arith.constant 0 : index
    %26 = vector.load %arg1[%c72, %c0_14] : memref<480x128xf32, #tpu.memory_space<vmem>>, vector<1x32xf32>
    %27 = vector.broadcast %26 : vector<1x32xf32> to vector<32x32xf32>
    %28 = arith.mulf %22, %27 : vector<32x32xf32>
    %c73 = arith.constant 73 : index
    %c0_15 = arith.constant 0 : index
    %29 = vector.load %arg1[%c73, %c0_15] : memref<480x128xf32, #tpu.memory_space<vmem>>, vector<1x32xf32>
    %30 = vector.broadcast %29 : vector<1x32xf32> to vector<32x32xf32>
    %31 = arith.mulf %22, %30 : vector<32x32xf32>
    %c74 = arith.constant 74 : index
    %c0_16 = arith.constant 0 : index
    %32 = vector.load %arg1[%c74, %c0_16] : memref<480x128xf32, #tpu.memory_space<vmem>>, vector<1x32xf32>
    %33 = vector.broadcast %32 : vector<1x32xf32> to vector<32x32xf32>
    %34 = arith.mulf %22, %33 : vector<32x32xf32>
    %c75 = arith.constant 75 : index
    %c0_17 = arith.constant 0 : index
    %35 = vector.load %arg1[%c75, %c0_17] : memref<480x128xf32, #tpu.memory_space<vmem>>, vector<1x32xf32>
    %36 = vector.broadcast %35 : vector<1x32xf32> to vector<32x32xf32>
    %37 = arith.mulf %22, %36 : vector<32x32xf32>
    %38 = tpu.concatenate %28, %31, %34, %37 in 0 : vector<32x32xf32>, vector<32x32xf32>, vector<32x32xf32>, vector<32x32xf32> -> vector<128x32xf32>
    "tpu.trace_start"() <{level = 10 : i32, message = "rd,cd->rc"}> : () -> ()
    %cst_18 = arith.constant dense<0.000000e+00> : vector<128x32xf32>
    %39 = tpu.matmul %38, %23, %cst_18 {dimension_numbers = #tpu.dot_dimension_numbers<[1], [1], [0], [0], [0, 0, 1, 0], [], []>} : vector<128x32xf32>, vector<32x32xf32>, vector<128x32xf32> -> vector<128x32xf32>
    "tpu.trace_stop"() : () -> ()
    %40 = tpu.concatenate %25, %25, %25, %25 in 0 : vector<32x32xf32>, vector<32x32xf32>, vector<32x32xf32>, vector<32x32xf32> -> vector<128x32xf32>
    %41 = arith.addf %39, %40 : vector<128x32xf32>
    %cst_19 = arith.constant dense<0xFF800000> : vector<128xf32>
    %42 = vector.multi_reduction <maximumf>, %41, %cst_19 [1] : vector<128x32xf32> to vector<128xf32>
    %43 = vector.shape_cast %42 : vector<128xf32> to vector<128x1xf32>
    %44 = vector.broadcast %43 : vector<128x1xf32> to vector<128x32xf32>
    %45 = arith.subf %41, %44 : vector<128x32xf32>
    %46 = math.exp %45 : vector<128x32xf32>
    %cst_20 = arith.constant dense<0.000000e+00> : vector<128xf32>
    %47 = vector.multi_reduction <add>, %46, %cst_20 [1] : vector<128x32xf32> to vector<128xf32>
    %48 = vector.shape_cast %47 : vector<128xf32> to vector<128x1xf32>
    %49 = tpu.reciprocal %48 {approx = true} : vector<128x1xf32> -> vector<128x1xf32>
    %50 = vector.broadcast %49 : vector<128x1xf32> to vector<128x32xf32>
    %51 = arith.mulf %46, %50 : vector<128x32xf32>
    %cst_21 = arith.constant dense<0.000000e+00> : vector<128x32xf32>
    %52 = tpu.matmul %51, %24, %cst_21 {dimension_numbers = #tpu.dot_dimension_numbers<[1], [0], [0], [1], [0, 0, 1, 1], [], []>} : vector<128x32xf32>, vector<32x32xf32>, vector<128x32xf32> -> vector<128x32xf32>
    %cst_22 = arith.constant 0.000000e+00 : f32
    %53 = vector.broadcast %cst_22 : f32 to vector<32x32xf32>
    %cst_23 = arith.constant 0.000000e+00 : f32
    %54 = vector.broadcast %cst_23 : f32 to vector<32x32xf32>
    %c76 = arith.constant 76 : index
    %c0_24 = arith.constant 0 : index
    %55 = vector.load %arg1[%c76, %c0_24] : memref<480x128xf32, #tpu.memory_space<vmem>>, vector<1x32xf32>
    %56 = vector.extract_strided_slice %52 {offsets = [0, 0], sizes = [32, 32], strides = [1, 1]} : vector<128x32xf32> to vector<32x32xf32>
    %57 = vector.broadcast %55 : vector<1x32xf32> to vector<32x32xf32>
    %58 = arith.mulf %56, %57 : vector<32x32xf32>
    %59 = arith.addf %53, %58 : vector<32x32xf32>
    %60 = vector.extract_strided_slice %51 {offsets = [0, 0], sizes = [32, 32], strides = [1, 1]} : vector<128x32xf32> to vector<32x32xf32>
    %61 = arith.addf %54, %60 : vector<32x32xf32>
    %c77 = arith.constant 77 : index
    %c0_25 = arith.constant 0 : index
    %62 = vector.load %arg1[%c77, %c0_25] : memref<480x128xf32, #tpu.memory_space<vmem>>, vector<1x32xf32>
    %63 = vector.extract_strided_slice %52 {offsets = [32, 0], sizes = [32, 32], strides = [1, 1]} : vector<128x32xf32> to vector<32x32xf32>
    %64 = vector.broadcast %62 : vector<1x32xf32> to vector<32x32xf32>
    %65 = arith.mulf %63, %64 : vector<32x32xf32>
    %66 = arith.addf %59, %65 : vector<32x32xf32>
    %67 = vector.extract_strided_slice %51 {offsets = [32, 0], sizes = [32, 32], strides = [1, 1]} : vector<128x32xf32> to vector<32x32xf32>
    %68 = arith.addf %61, %67 : vector<32x32xf32>
    %c78 = arith.constant 78 : index
    %c0_26 = arith.constant 0 : index
    %69 = vector.load %arg1[%c78, %c0_26] : memref<480x128xf32, #tpu.memory_space<vmem>>, vector<1x32xf32>
    %70 = vector.extract_strided_slice %52 {offsets = [64, 0], sizes = [32, 32], strides = [1, 1]} : vector<128x32xf32> to vector<32x32xf32>
    %71 = vector.broadcast %69 : vector<1x32xf32> to vector<32x32xf32>
    %72 = arith.mulf %70, %71 : vector<32x32xf32>
    %73 = arith.addf %66, %72 : vector<32x32xf32>
    %74 = vector.extract_strided_slice %51 {offsets = [64, 0], sizes = [32, 32], strides = [1, 1]} : vector<128x32xf32> to vector<32x32xf32>
    %75 = arith.addf %68, %74 : vector<32x32xf32>
    %c79 = arith.constant 79 : index
    %c0_27 = arith.constant 0 : index
    %76 = vector.load %arg1[%c79, %c0_27] : memref<480x128xf32, #tpu.memory_space<vmem>>, vector<1x32xf32>
    %77 = vector.extract_strided_slice %52 {offsets = [96, 0], sizes = [32, 32], strides = [1, 1]} : vector<128x32xf32> to vector<32x32xf32>
    %78 = vector.broadcast %76 : vector<1x32xf32> to vector<32x32xf32>
    %79 = arith.mulf %77, %78 : vector<32x32xf32>
    %80 = arith.addf %73, %79 : vector<32x32xf32>
    %81 = vector.extract_strided_slice %51 {offsets = [96, 0], sizes = [32, 32], strides = [1, 1]} : vector<128x32xf32> to vector<32x32xf32>
    %82 = arith.addf %75, %81 : vector<32x32xf32>
    %c112 = arith.constant 112 : index
    %c0_28 = arith.constant 0 : index
    %83 = vector.load %arg1[%c112, %c0_28] : memref<480x128xf32, #tpu.memory_space<vmem>>, vector<32x32xf32>
    %cst_29 = arith.constant dense<0.000000e+00> : vector<32x32xf32>
    %84 = tpu.matmul %80, %83, %cst_29 {dimension_numbers = #tpu.dot_dimension_numbers<[1], [0], [0], [1], [0, 0, 1, 1], [], []>} : vector<32x32xf32>, vector<32x32xf32>, vector<32x32xf32> -> vector<32x32xf32>
    %c144 = arith.constant 144 : index
    %c0_30 = arith.constant 0 : index
    %85 = vector.load %arg1[%c144, %c0_30] : memref<480x128xf32, #tpu.memory_space<vmem>>, vector<1x32xf32>
    %86 = vector.broadcast %85 : vector<1x32xf32> to vector<32x32xf32>
    %87 = arith.addf %84, %86 : vector<32x32xf32>
    %c152 = arith.constant 152 : index
    %c0_31 = arith.constant 0 : index
    %88 = vector.load %arg1[%c152, %c0_31] : memref<480x128xf32, #tpu.memory_space<vmem>>, vector<8x32xf32>
    %cst_32 = arith.constant dense<0.000000e+00> : vector<8x32xf32>
    %89 = tpu.matmul %88, %87, %cst_32 {dimension_numbers = #tpu.dot_dimension_numbers<[1], [0], [0], [1], [0, 0, 1, 1], [], []>} : vector<8x32xf32>, vector<32x32xf32>, vector<8x32xf32> -> vector<8x32xf32>
    %c160 = arith.constant 160 : index
    %c0_33 = arith.constant 0 : index
    %90 = vector.load %arg1[%c160, %c0_33] : memref<480x128xf32, #tpu.memory_space<vmem>>, vector<8x32xf32>
    %cst_34 = arith.constant dense<0.000000e+00> : vector<8x32xf32>
    %91 = tpu.matmul %90, %87, %cst_34 {dimension_numbers = #tpu.dot_dimension_numbers<[1], [0], [0], [1], [0, 0, 1, 1], [], []>} : vector<8x32xf32>, vector<32x32xf32>, vector<8x32xf32> -> vector<8x32xf32>
    %c168 = arith.constant 168 : index
    %c0_35 = arith.constant 0 : index
    %92 = vector.load %arg1[%c168, %c0_35] : memref<480x128xf32, #tpu.memory_space<vmem>>, vector<8x32xf32>
    %cst_36 = arith.constant dense<0.000000e+00> : vector<8x32xf32>
    %93 = tpu.matmul %92, %87, %cst_36 {dimension_numbers = #tpu.dot_dimension_numbers<[1], [0], [0], [1], [0, 0, 1, 1], [], []>} : vector<8x32xf32>, vector<32x32xf32>, vector<8x32xf32> -> vector<8x32xf32>
    %c176 = arith.constant 176 : index
    %c0_37 = arith.constant 0 : index
    %94 = vector.load %arg1[%c176, %c0_37] : memref<480x128xf32, #tpu.memory_space<vmem>>, vector<8x32xf32>
    %cst_38 = arith.constant dense<0.000000e+00> : vector<8x32xf32>
    %95 = tpu.matmul %94, %87, %cst_38 {dimension_numbers = #tpu.dot_dimension_numbers<[1], [0], [0], [1], [0, 0, 1, 1], [], []>} : vector<8x32xf32>, vector<32x32xf32>, vector<8x32xf32> -> vector<8x32xf32>
    %96 = tpu.concatenate %89, %91, %93, %95 in 1 : vector<8x32xf32>, vector<8x32xf32>, vector<8x32xf32>, vector<8x32xf32> -> vector<8x128xf32>
    %c184 = arith.constant 184 : index
    %c0_39 = arith.constant 0 : index
    %97 = vector.load %arg1[%c184, %c0_39] : memref<480x128xf32, #tpu.memory_space<vmem>>, vector<128x128xf32>
    %cst_40 = arith.constant dense<0.000000e+00> : vector<8x128xf32>
    %98 = tpu.matmul %96, %97, %cst_40 {dimension_numbers = #tpu.dot_dimension_numbers<[1], [0], [0], [1], [0, 0, 1, 1], [], []>} : vector<8x128xf32>, vector<128x128xf32>, vector<8x128xf32> -> vector<8x128xf32>
    %c440 = arith.constant 440 : index
    %c0_41 = arith.constant 0 : index
    %99 = vector.load %arg1[%c440, %c0_41] : memref<480x128xf32, #tpu.memory_space<vmem>>, vector<1x128xf32>
    %100 = vector.broadcast %99 : vector<1x128xf32> to vector<8x128xf32>
    %101 = arith.addf %98, %100 : vector<8x128xf32>
    %c0_42 = arith.constant 0 : index
    %c0_43 = arith.constant 0 : index
    %102 = vector.load %arg2[%c0_42, %c0_43] : memref<8x256xf32, #tpu.memory_space<vmem>>, vector<8x128xf32>
    tpu.vector_store %arg2[%c0_42, %c0_43], %101 {strides = array<i32>} : memref<8x256xf32, #tpu.memory_space<vmem>>, vector<8x128xf32>,
    %c312 = arith.constant 312 : index
    %c0_44 = arith.constant 0 : index
    %103 = vector.load %arg1[%c312, %c0_44] : memref<480x128xf32, #tpu.memory_space<vmem>>, vector<128x128xf32>
    %cst_45 = arith.constant dense<0.000000e+00> : vector<8x128xf32>
    %104 = tpu.matmul %96, %103, %cst_45 {dimension_numbers = #tpu.dot_dimension_numbers<[1], [0], [0], [1], [0, 0, 1, 1], [], []>} : vector<8x128xf32>, vector<128x128xf32>, vector<8x128xf32> -> vector<8x128xf32>
    %c441 = arith.constant 441 : index
    %c0_46 = arith.constant 0 : index
    %105 = vector.load %arg1[%c441, %c0_46] : memref<480x128xf32, #tpu.memory_space<vmem>>, vector<1x128xf32>
    %106 = vector.broadcast %105 : vector<1x128xf32> to vector<8x128xf32>
    %107 = arith.addf %104, %106 : vector<8x128xf32>
    %c0_47 = arith.constant 0 : index
    %c128 = arith.constant 128 : index
    %108 = vector.load %arg2[%c0_47, %c128] : memref<8x256xf32, #tpu.memory_space<vmem>>, vector<8x128xf32>
    tpu.vector_store %arg2[%c0_47, %c128], %107 {strides = array<i32>} : memref<8x256xf32, #tpu.memory_space<vmem>>, vector<8x128xf32>,
    %c448 = arith.constant 448 : index
    %c0_48 = arith.constant 0 : index
    %109 = vector.load %arg1[%c448, %c0_48] : memref<480x128xf32, #tpu.memory_space<vmem>>, vector<32x128xf32>
    %cst_49 = arith.constant dense<0.000000e+00> : vector<32x128xf32>
    %110 = tpu.matmul %82, %109, %cst_49 {dimension_numbers = #tpu.dot_dimension_numbers<[1], [0], [0], [1], [0, 0, 1, 1], [], []>} : vector<32x32xf32>, vector<32x128xf32>, vector<32x128xf32> -> vector<32x128xf32>
    %c0_50 = arith.constant 0 : index
    %c0_51 = arith.constant 0 : index
    %111 = vector.load %arg3[%c0_50, %c0_51] : memref<32x128xf32, #tpu.memory_space<vmem>>, vector<32x128xf32>
    tpu.vector_store %arg3[%c0_50, %c0_51], %110 {strides = array<i32>} : memref<32x128xf32, #tpu.memory_space<vmem>>, vector<32x128xf32>,
    return
  }
}

</mosaic_0001>

<bundles_post_ra>
// kernel: forward.1
= control target key start
LH: loop header
LB: loop body
LE: loop exit
PB: predicated region body
PF: predicated region fallthrough
CT: control target
= control target key end

     0   :  { %9 = vsyncpa [#allocation3], 0  ;;  %s2865_s0 = inlined_call_operand.hbm [shape: f32[8,16], index: 0, kind: input, shape index: {}]   ;;  %s2866_s1 = inlined_call_operand.hbm [shape: f32[480,128], index: 1, kind: input, shape index: {}]   ;;  %s2867_s2 = inlined_call_operand.hbm [shape: f32[8,256], index: 2, kind: output, shape index: {0}]   ;;  %s2868_s3 = inlined_call_operand.vmem [shape: f32[32,128], index: 3, kind: output, shape index: {1}]  }
   0x1   :  { %10 = vsyncpa [#allocation6], 0 }
   0x2   :  { %11 = vsyncpa [#allocation4], 0  ;;  %s2494_s12 = smov [#allocation2]   ;;  %s2495_s14 = smov [#allocation5]  }
   0x3   :  { %s18_s13 = sshll.u32 %s2494_s12, 4  ;;  %s27_s15 = sshll.u32 %s2495_s14, 4  ;;  %s19_s13 = int_to_ptr.vmem [resolvable:$true] %s18_s13  ;;  %s2525_s15 = int_to_ptr.vmem [resolvable:$true] %s27_s15 }
   0x4   :  { %s2422_s18 = scalar_lea.hbm %s2865_s0, 128 }
   0x5   :  { %p2423_p0 = scmp.ne.s32.totalorder %s2865_s0, %s2422_s18  ;;  %p2426_p1 = scmp.lt.u32.totalorder %s2422_s18, %s2865_s0 }
   0x7   :  { %p2428_p2 = pnand %p2426_p1, %p2423_p0 }
   0x9   :  { %2431 = shalt.err (!%p2428_p2)
}
   0xa   :  { %s2432_s23 = scalar_lea.vmem %s19_s13, 128  ;;  %p2437_p4 = scmp.lt.s32.totalorder %s19_s13, %s19_s13 }
   0xb   :  { %p2433_p3 = scmp.ne.s32.totalorder %s19_s13, %s2432_s23  ;;  %p2438_p5 = scmp.lt.s32.totalorder %s2432_s23, %s2432_s23 }
   0xd   :  { %p2439_p6 = por %p2438_p5, %p2437_p4 }
   0xf   :  { %p2440_p7 = pnand %p2439_p6, %p2433_p3 }
  0x11   :  { %2443 = shalt.err (!%p2440_p7)
}
  0x12   :  { %21 = dma.hbm_to_vmem [thread:$0]  %s2865_s0, 128, %s19_s13, [#allocation3]  }
  0x13   :  { %s2444_s28 = scalar_lea.hbm %s2866_s1, 7680 }
  0x14   :  { %p2445_p8 = scmp.ne.s32.totalorder %s2866_s1, %s2444_s28  ;;  %p2448_p9 = scmp.lt.u32.totalorder %s2444_s28, %s2866_s1 }
  0x16   :  { %p2450_p10 = pnand %p2448_p9, %p2445_p8 }
  0x18   :  { %2453 = shalt.err (!%p2450_p10)
}
  0x19   :  { %s2454_s6 = scalar_lea.vmem %s2525_s15, 7680  ;;  %p2459_p12 = scmp.lt.s32.totalorder %s2525_s15, %s2525_s15 }
  0x1a   :  { %p2455_p11 = scmp.ne.s32.totalorder %s2525_s15, %s2454_s6  ;;  %p2460_p13 = scmp.lt.s32.totalorder %s2454_s6, %s2454_s6 }
  0x1c   :  { %p2461_p0 = por %p2460_p13, %p2459_p12 }
  0x1e   :  { %p2462_p1 = pnand %p2461_p0, %p2455_p11 }
  0x20   :  { %2465 = shalt.err (!%p2462_p1)
}
  0x21   :  { %s2496_s0 = smov 128   ;;  %s2497_s7 = smov 8  }
  0x22   :  { %33 = dma.hbm_to_vmem [thread:$0]  %s2866_s1, 7680, %s2525_s15, [#allocation6], %s2496_s0, %s2496_s0, %s2497_s7  }
  0x23   :  { %2488 = dma.done.wait [#allocation3], 128  }
  0x24   :  { %2489 = vsyncadd [#allocation3], 4294967168 }
  0x25   :  { %2490 = dma.done.wait [#allocation6], 7680  }
  0x26   :  { %2491 = vsyncadd [#allocation6], 4294959616  ;;  %v2498_v0 = vmov 0.0|0.0   ;;  %vm2499_vm0 = vmmov 0   ;;  %v2500_v1 = vmov 0.0   ;;  %v41_v2 = vld [vmem:[#allocation5] sm:$0xff] }
  0x27   :  { %2207 = vmatprep.subr.bf16.mxu1 %v2498_v0  ;;  %1977 = vmatprep.mubr.msk.f32.mxu1 %vm2499_vm0, %v2500_v1  ;;  %v42_v3 = vld [vmem:[#allocation5 + $0x8] sm:$0xff]  ;;  %v122_v5 = vld [vmem:[#allocation5 + $0x10] sm:$0xff]  ;;  %v123_v6 = vld [vmem:[#allocation5 + $0x18] sm:$0xff]  ;;  %vm48_vm1 = vcmask 130048   ;;  %vm405_vm2 = vcmask 261120   ;;  %s2501_s1 = smov 96  }
  0x28   :  { %2213 = vmatprep.subr.bf16.mxu0 %v2498_v0  ;;  %1991 = vmatprep.mubr.msk.f32.mxu0 %vm2499_vm0, %v2500_v1  ;;  %v2208_v4 = vpack.c.bf16 %v42_v3, %v41_v2  ;;  %v199_v7 = vld [vmem:[#allocation5 + $0x20] sm:$0xff]  ;;  %v200_v8 = vld [vmem:[#allocation5 + $0x28] sm:$0xff]  ;;  %v40_v9 = vld [vmem:[#allocation2] sm:$0xff]  ;;  %v2211_v10 = vpack.c.bf16 %v123_v6, %v122_v5  ;;  %s2502_s10 = smov 64   ;;  %s2503_s11 = smov 32   ;;  %vm1471_vm4 = vcmask 523264  }
  0x29   :  { %v2214_v11 = vpack.c.bf16 %v200_v8, %v199_v7  ;;  %v276_v12 = vld [vmem:[#allocation5 + $0x30] sm:$0xff]  ;;  %v277_v13 = vld [vmem:[#allocation5 + $0x38] sm:$0xff]  ;;  %v1784_v15 = vld [vmem:[#allocation5 + $0x40] ss:$0 sm:$0xff]  ;;  %vm1473_vm5 = vcmask 785408   ;;  %s2504_s12 = smov [#allocation7]  }
  0x2a   :  { %2209 = vmatpush3.bf16.msra.mxu1 %v2208_v4  ;;  %v2217_v14 = vpack.c.bf16 %v277_v13, %v276_v12  ;;  %v1792_v17 = vld [vmem:[#allocation5 + $0x48] ss:$0 sm:$0xff]  ;;  %v1788_v18 = vld [vmem:[#allocation5 + $0x42] ss:$0 sm:$0xff]  ;;  %v1786_v21 = vld [vmem:[#allocation5 + $0x41] ss:$0 sm:$0xff] }
  0x2b   :  { %2210 = vmatprep.subr.bf16.mxu1 %v2498_v0  ;;  %2215 = vmatpush3.bf16.msra.mxu0 %v2214_v11  ;;  %v1790_v30 = vld [vmem:[#allocation5 + $0x43] ss:$0 sm:$0xff]  ;;  %vm2220_vm3 = vmpackc.low %vm405_vm2, %vm405_vm2  ;;  %v1793_v46 = vld [vmem:[#allocation5 + $0x49] ss:$0 sm:$0xff]  ;;  %s1770_s13 = sshll.u32 %s2504_s12, 4  ;;  %s1771_s13 = int_to_ptr.vmem [resolvable:$true] %s1770_s13 }
  0x2c   :  { %v1794_v50 = vld [vmem:[#allocation5 + $0x4a] ss:$0 sm:$0xff]  ;;  %v1795_v55 = vld [vmem:[#allocation5 + $0x4b] ss:$0 sm:$0xff]  ;;  %v354_v61 = vld [vmem:[#allocation5 + $0x58] sm:$0xff]  ;;  %s2466_s14 = scalar_lea.vmem %s1771_s13, 256  ;;  %p2471_p3 = scmp.lt.s32.totalorder %s1771_s13, %s1771_s13 }
  0x2d   :  { %1978 = vmatmul.mubr.msk.f32.vlgmr.msra.gmra.mrb[0].mxu1 %vm48_vm1, %v40_v9  ;;  %v353_v63 = vld [vmem:[#allocation5 + $0x50] sm:$0xff]  ;;  %v355_v6 = vld [vmem:[#allocation5 + $0x60] sm:$0xff]  ;;  %v356_v7 = vld [vmem:[#allocation5 + $0x68] sm:$0xff]  ;;  %p2467_p2 = scmp.ne.s32.totalorder %s1771_s13, %s2466_s14  ;;  %p2472_p4 = scmp.lt.s32.totalorder %s2466_s14, %s2466_s14 }
  0x2e   :  { %2212 = vmatpush3.bf16.msra.mxu1 %v2211_v10  ;;  %1984 = vmatprep.mubr.msk.f32.mxu1 %vm2499_vm0, %v2500_v1 }
  0x2f   :  { %2216 = vmatprep.subr.bf16.mxu1 %v2498_v0  ;;  %1992 = vmatmul.mubr.msk.f32.vlgmr.msra.gmra.mrb[0].mxu0 %vm48_vm1, %v40_v9  ;;  %p2473_p5 = por %p2472_p4, %p2471_p3 }
  0x31   :  { %1985 = vmatmul.mubr.msk.f32.vlgmr.msra.gmra.mrb[2].mxu1 %vm48_vm1, %v40_v9  ;;  %p2474_p6 = pnand %p2473_p5, %p2467_p2 }
  0x32   :  { %2218 = vmatpush3.bf16.msra.mxu1 %v2217_v14  ;;  %1998 = vmatprep.mubr.msk.f32.mxu1 %vm2499_vm0, %v2500_v1 }
  0x35   :  { %1999 = vmatmul.mubr.msk.f32.vlgmr.msra.gmra.mrb[4].mxu1 %vm48_vm1, %v40_v9 }
 0x100   :  { %v118_v16 = vpop.f32.mrb[0].mxu1 }
 0x101   :  { %v119_v19 = vadd.f32 %v1784_v15, %v118_v16  ;;  %v1979_v20 = vpop.f32.mrb[1].mxu1 }
 0x102   :  { %v272_v22 = vpop.f32.mrb[0].mxu0 }
 0x103   :  { %v362_v23 = vmul.f32 %v1792_v17, %v119_v19  ;;  %v273_v24 = vadd.f32 %v1788_v18, %v272_v22  ;;  %v1993_v25 = vpop.f32.mrb[1].mxu0  ;;  %v371_v47 = vmul.f32 %v1793_v46, %v119_v19  ;;  %v380_v52 = vmul.f32 %v1794_v50, %v119_v19 }
 0x104   :  { %v195_v26 = vpop.f32.mrb[2].mxu1  ;;  %v389_v57 = vmul.f32 %v1795_v55, %v119_v19 }
 0x105   :  { %v196_v27 = vadd.f32 %v1786_v21, %v195_v26  ;;  %v1986_v28 = vpop.f32.mrb[3].mxu1  ;;  %2009 = vmatprep.mubr.msk.f32.mxu0 %vm405_vm2, %v362_v23  ;;  %v364_v29 = vmul.f32 %v1792_v17, %v273_v24  ;;  %v373_v49 = vmul.f32 %v1793_v46, %v273_v24  ;;  %v382_v54 = vmul.f32 %v1794_v50, %v273_v24 }
 0x106   :  { %v391_v59 = vmul.f32 %v1795_v55, %v273_v24 }
 0x107   :  { %v2573_v31 = vpack.i.bf16 %v196_v27, %v119_v19  ;;  %v363_v32 = vmul.f32 %v1792_v17, %v196_v27  ;;  %v372_v48 = vmul.f32 %v1793_v46, %v196_v27  ;;  %v381_v53 = vmul.f32 %v1794_v50, %v196_v27 }
 0x108   :  { %v349_v33 = vpop.f32.mrb[4].mxu1  ;;  %v390_v58 = vmul.f32 %v1795_v55, %v196_v27 }
 0x109   :  { %2339 = vrot.lane.b32.xlu0 %v2573_v31, %s2501_s1  ;;  %v350_v34 = vadd.f32 %v1790_v30, %v349_v33  ;;  %v2000_v35 = vpop.f32.mrb[5].mxu1 }
 0x10b   :  { %v2577_v36 = vpack.i.bf16 %v350_v34, %v273_v24  ;;  %v365_v37 = vmul.f32 %v1792_v17, %v350_v34  ;;  %v374_v51 = vmul.f32 %v1793_v46, %v350_v34  ;;  %v383_v56 = vmul.f32 %v1794_v50, %v350_v34 }
 0x10c   :  { %v392_v60 = vmul.f32 %v1795_v55, %v350_v34 }
 0x10d   :  { %2344 = vrot.lane.b32.xlu0 %v2577_v36, %s2501_s1 }
 0x17b   :  { %v2340_v38 = vpop.permute.xlu0 %2339 }
 0x17c   :  { %v2342_v39 = vunpack.i.h.bf16 %v2340_v38  ;;  %v2341_v40 = vunpack.i.l.bf16 %v2340_v38 }
 0x17e   :  { %v2219_v41 = vpack.c.bf16 %v2342_v39, %v2341_v40 }
 0x17f   :  { %v2345_v42 = vpop.permute.xlu0 %2344 }
 0x180   :  { %2221 = vmatprep.subr.msk.bf16.mxu0 %vm2220_vm3, %v2219_v41  ;;  %v2347_v43 = vunpack.i.h.bf16 %v2345_v42  ;;  %v2346_v44 = vunpack.i.l.bf16 %v2345_v42 }
 0x181   :  { %2224 = vmatpush3.bf16.xpose.msk.msra.mxu0 %vm2220_vm3, %v2219_v41 }
 0x182   :  { %v2225_v45 = vpack.c.bf16 %v2347_v43, %v2346_v44 }
 0x184   :  { %2227 = vmatprep.subr.msk.bf16.mxu0 %vm2220_vm3, %v2225_v45 }
 0x189   :  { %2230 = vmatpush3.bf16.xpose.msk.msra.mxu0 %vm2220_vm3, %v2225_v45 }
 0x18a   :  { %2247 = vmatprep.subr.bf16.mxu0 %v2498_v0 }
 0x190   :  { %2010 = vmatmul.mubr.msk.f32.vlgmr.msra.gmra.mrb[2].mxu0 %vm405_vm2, %v363_v32 }
 0x191   :  { %2012 = vmatprep.mubr.msk.f32.mxu0 %vm405_vm2, %v364_v29 }
 0x194   :  { %2013 = vmatmul.mubr.msk.f32.gmra.mrb[4].mxu0 %vm405_vm2, %v365_v37 }
 0x195   :  { %2015 = vmatprep.mubr.msk.f32.mxu0 %vm405_vm2, %v371_v47 }
 0x198   :  { %2016 = vmatmul.mubr.msk.f32.gmra.mrb[6].mxu0 %vm405_vm2, %v372_v48 }
 0x199   :  { %2018 = vmatprep.mubr.msk.f32.mxu0 %vm405_vm2, %v373_v49 }
 0x19c   :  { %2019 = vmatmul.mubr.msk.f32.gmra.mrb[8].mxu0 %vm405_vm2, %v374_v51 }
 0x19d   :  { %2021 = vmatprep.mubr.msk.f32.mxu0 %vm405_vm2, %v380_v52 }
 0x1a0   :  { %2022 = vmatmul.mubr.msk.f32.gmra.mrb[10].mxu0 %vm405_vm2, %v381_v53 }
 0x1a1   :  { %2024 = vmatprep.mubr.msk.f32.mxu0 %vm405_vm2, %v382_v54 }
 0x1a4   :  { %2025 = vmatmul.mubr.msk.f32.gmra.mrb[12].mxu0 %vm405_vm2, %v383_v56 }
 0x1a5   :  { %2027 = vmatprep.mubr.msk.f32.mxu0 %vm405_vm2, %v389_v57 }
 0x1a8   :  { %2028 = vmatmul.mubr.msk.f32.gmra.mrb[14].mxu0 %vm405_vm2, %v390_v58 }
 0x1a9   :  { %2030 = vmatprep.mubr.msk.f32.mxu0 %vm405_vm2, %v391_v59 }
 0x1ac   :  { %2031 = vmatmul.mubr.msk.f32.gmra.mrb[16].mxu0 %vm405_vm2, %v392_v60 }
 0x1ad   :  { %2087 = vmatprep.mubr.msk.f32.mxu0 %vm2499_vm0, %v2500_v1 }
 0x263   :  { %v2011_v62 = vpop.f32.mrb[2].mxu0 }
 0x264   :  { %v2601_v2 = vadd.f32 %v2011_v62, %v354_v61  ;;  %v528_v3 = vpop.f32.mrb[3].mxu0 }
 0x265   :  { %v2603_v4 = vadd.f32 %v528_v3, %v353_v63 }
 0x266   :  { %v610_v5 = vsel %vm405_vm2, %v2601_v2, -inf }
 0x267   :  { %611 = vmax.xlane.f32.xlu1 %v610_v5  ;;  %v2014_v8 = vpop.f32.mrb[4].mxu0  ;;  %v607_v12 = vsel %vm405_vm2, %v2603_v4, -inf }
 0x268   :  { %v538_v9 = vpop.f32.mrb[5].mxu0  ;;  %v2609_v11 = vadd.f32 %v2014_v8, %v356_v7 }
 0x269   :  { %v2607_v10 = vadd.f32 %v538_v9, %v355_v6 }
 0x26a   :  { %v616_v17 = vsel %vm405_vm2, %v2609_v11, -inf }
 0x26b   :  { %608 = vmax.xlane.f32.xlu1 %v607_v12  ;;  %v2017_v13 = vpop.f32.mrb[6].mxu0  ;;  %v613_v14 = vsel %vm405_vm2, %v2607_v10, -inf }
 0x26c   :  { %v548_v15 = vpop.f32.mrb[7].mxu0  ;;  %614 = vmax.xlane.f32.xlu0 %v613_v14  ;;  %v2615_v16 = vadd.f32 %v2017_v13, %v354_v61 }
 0x26d   :  { %v2619_v20 = vadd.f32 %v548_v15, %v353_v63 }
 0x26e   :  { %v622_v21 = vsel %vm405_vm2, %v2615_v16, -inf }
 0x26f   :  { %617 = vmax.xlane.f32.xlu1 %v616_v17  ;;  %v2020_v18 = vpop.f32.mrb[8].mxu0  ;;  %v619_v25 = vsel %vm405_vm2, %v2619_v20, -inf }
 0x270   :  { %v558_v19 = vpop.f32.mrb[9].mxu0  ;;  %v2623_v24 = vadd.f32 %v2020_v18, %v356_v7 }
 0x271   :  { %v2629_v29 = vadd.f32 %v558_v19, %v355_v6 }
 0x272   :  { %v628_v30 = vsel %vm405_vm2, %v2623_v24, -inf }
 0x273   :  { %623 = vmax.xlane.f32.xlu1 %v622_v21  ;;  %v2023_v22 = vpop.f32.mrb[10].mxu0  ;;  %v625_v38 = vsel %vm405_vm2, %v2629_v29, -inf }
 0x274   :  { %v568_v23 = vpop.f32.mrb[11].mxu0  ;;  %v2637_v37 = vadd.f32 %v2023_v22, %v354_v61 }
 0x275   :  { %v2645_v43 = vadd.f32 %v568_v23, %v353_v63 }
 0x276   :  { %v634_v44 = vsel %vm405_vm2, %v2637_v37, -inf }
 0x277   :  { %v2026_v26 = vpop.f32.mrb[12].mxu0  ;;  %620 = vmax.xlane.f32.xlu1 %v619_v25  ;;  %v631_v47 = vsel %vm405_vm2, %v2645_v43, -inf }
 0x278   :  { %v2627_v27 = vadd.f32 %v2026_v26, %v356_v7  ;;  %v578_v28 = vpop.f32.mrb[13].mxu0 }
 0x279   :  { %v2651_v46 = vadd.f32 %v578_v28, %v355_v6 }
 0x27a   :  { %v640_v32 = vsel %vm405_vm2, %v2627_v27, -inf }
 0x27b   :  { %v2029_v33 = vpop.f32.mrb[14].mxu0  ;;  %629 = vmax.xlane.f32.xlu1 %v628_v30  ;;  %641 = vmax.xlane.f32.xlu0 %v640_v32  ;;  %v637_v49 = vsel %vm405_vm2, %v2651_v46, -inf }
 0x27c   :  { %v2635_v34 = vadd.f32 %v2029_v33, %v354_v61  ;;  %v588_v35 = vpop.f32.mrb[15].mxu0 }
 0x27d   :  { %v2655_v48 = vadd.f32 %v588_v35, %v353_v63 }
 0x27e   :  { %v646_v39 = vsel %vm405_vm2, %v2635_v34, -inf }
 0x27f   :  { %v2032_v40 = vpop.f32.mrb[16].mxu0  ;;  %626 = vmax.xlane.f32.xlu1 %v625_v38  ;;  %647 = vmax.xlane.f32.xlu0 %v646_v39  ;;  %v643_v51 = vsel %vm405_vm2, %v2655_v48, -inf }
 0x280   :  { %v2643_v41 = vadd.f32 %v2032_v40, %v356_v7  ;;  %v598_v42 = vpop.f32.mrb[17].mxu0 }
 0x281   :  { %v2659_v50 = vadd.f32 %v598_v42, %v355_v6 }
 0x282   :  { %v652_v45 = vsel %vm405_vm2, %v2643_v41, -inf }
 0x283   :  { %635 = vmax.xlane.f32.xlu1 %v634_v44  ;;  %653 = vmax.xlane.f32.xlu0 %v652_v45  ;;  %v649_v52 = vsel %vm405_vm2, %v2659_v50, -inf }
 0x287   :  { %632 = vmax.xlane.f32.xlu1 %v631_v47 }
 0x28b   :  { %638 = vmax.xlane.f32.xlu1 %v637_v49 }
 0x28f   :  { %644 = vmax.xlane.f32.xlu1 %v643_v51 }
 0x293   :  { %650 = vmax.xlane.f32.xlu1 %v649_v52 }
 0x2f4   :  { %v612_v53 = vpop.xlane.xlu1 %611 }
 0x2f5   :  { %v656_v54 = vsub.f32 %v2601_v2, %v612_v53 }
 0x2f7   :  { %v673_v55 = vmul.f32 1.442695, %v656_v54 }
 0x2f8   :  { %v609_v56 = vpop.xlane.xlu1 %608 }
 0x2f9   :  { %2358 = vpow2.f32 %v673_v55  ;;  %v655_v57 = vsub.f32 %v2603_v4, %v609_v56  ;;  %v615_v58 = vpop.xlane.xlu0 %614 }
 0x2fa   :  { %v657_v59 = vsub.f32 %v2607_v10, %v615_v58 }
 0x2fb   :  { %v671_v60 = vmul.f32 1.442695, %v655_v57 }
 0x2fc   :  { %v675_v61 = vmul.f32 1.442695, %v657_v59  ;;  %v618_v62 = vpop.xlane.xlu1 %617 }
 0x2fd   :  { %2360 = vpow2.f32 %v671_v60  ;;  %v658_v63 = vsub.f32 %v2609_v11, %v618_v62 }
 0x2fe   :  { %2362 = vpow2.f32 %v675_v61 }
 0x2ff   :  { %v677_v3 = vmul.f32 1.442695, %v658_v63 }
 0x300   :  { %v624_v5 = vpop.xlane.xlu1 %623 }
 0x301   :  { %2364 = vpow2.f32 %v677_v3  ;;  %v660_v2 = vsub.f32 %v2615_v16, %v624_v5 }
 0x303   :  { %v2670_v6 = vpop.eup %2358  ;;  %v681_v7 = vmul.f32 1.442695, %v660_v2 }
 0x304   :  { %v621_v8 = vpop.xlane.xlu1 %620  ;;  %v706_v4 = vsel %vm405_vm2, %v2670_v6, 0.0 }
 0x305   :  { %2366 = vpow2.f32 %v681_v7  ;;  %v659_v9 = vsub.f32 %v2619_v20, %v621_v8  ;;  %707 = vadd.xlane.f32.xlu0 %v706_v4 }
 0x307   :  { %v2675_v10 = vpop.eup %2360  ;;  %v679_v11 = vmul.f32 1.442695, %v659_v9 }
 0x308   :  { %v630_v12 = vpop.xlane.xlu1 %629  ;;  %v703_v13 = vsel %vm405_vm2, %v2675_v10, 0.0  ;;  %v2679_v14 = vpop.eup %2362 }
 0x309   :  { %2368 = vpow2.f32 %v679_v11  ;;  %v662_v15 = vsub.f32 %v2623_v24, %v630_v12  ;;  %704 = vadd.xlane.f32.xlu1 %v703_v13  ;;  %v642_v18 = vpop.xlane.xlu0 %641  ;;  %v709_v21 = vsel %vm405_vm2, %v2679_v14, 0.0 }
 0x30a   :  { %v666_v24 = vsub.f32 %v2627_v27, %v642_v18 }
 0x30b   :  { %v2682_v16 = vpop.eup %2364  ;;  %v685_v17 = vmul.f32 1.442695, %v662_v15 }
 0x30c   :  { %v627_v19 = vpop.xlane.xlu1 %626  ;;  %v712_v20 = vsel %vm405_vm2, %v2682_v16, 0.0  ;;  %v693_v33 = vmul.f32 1.442695, %v666_v24 }
 0x30d   :  { %2370 = vpow2.f32 %v685_v17  ;;  %v661_v22 = vsub.f32 %v2629_v29, %v627_v19  ;;  %713 = vadd.xlane.f32.xlu0 %v712_v20  ;;  %710 = vadd.xlane.f32.xlu1 %v709_v21  ;;  %v648_v58 = vpop.xlane.xlu0 %647 }
 0x30e   :  { %v668_v61 = vsub.f32 %v2635_v34, %v648_v58 }
 0x30f   :  { %v2689_v23 = vpop.eup %2366  ;;  %v683_v25 = vmul.f32 1.442695, %v661_v22 }
 0x310   :  { %v636_v26 = vpop.xlane.xlu1 %635  ;;  %v718_v28 = vsel %vm405_vm2, %v2689_v23, 0.0  ;;  %v697_v5 = vmul.f32 1.442695, %v668_v61 }
 0x311   :  { %2372 = vpow2.f32 %v683_v25  ;;  %v664_v30 = vsub.f32 %v2637_v37, %v636_v26  ;;  %719 = vadd.xlane.f32.xlu0 %v718_v28  ;;  %v654_v3 = vpop.xlane.xlu0 %653 }
 0x312   :  { %v670_v2 = vsub.f32 %v2643_v41, %v654_v3 }
 0x313   :  { %v2695_v32 = vpop.eup %2368  ;;  %v689_v35 = vmul.f32 1.442695, %v664_v30 }
 0x314   :  { %v633_v29 = vpop.xlane.xlu1 %632  ;;  %v715_v38 = vsel %vm405_vm2, %v2695_v32, 0.0 }
 0x315   :  { %2374 = vpow2.f32 %v689_v35  ;;  %v663_v27 = vsub.f32 %v2645_v43, %v633_v29  ;;  %716 = vadd.xlane.f32.xlu1 %v715_v38 }
 0x316   :  { %2376 = vpow2.f32 %v693_v33 }
 0x317   :  { %v2700_v39 = vpop.eup %2370  ;;  %v687_v40 = vmul.f32 1.442695, %v663_v27 }
 0x318   :  { %v639_v42 = vpop.xlane.xlu1 %638  ;;  %v724_v37 = vsel %vm405_vm2, %v2700_v39, 0.0 }
 0x319   :  { %2378 = vpow2.f32 %v687_v40  ;;  %v665_v44 = vsub.f32 %v2651_v46, %v639_v42  ;;  %725 = vadd.xlane.f32.xlu0 %v724_v37 }
 0x31b   :  { %v2705_v45 = vpop.eup %2372  ;;  %v691_v47 = vmul.f32 1.442695, %v665_v44 }
 0x31c   :  { %v721_v49 = vsel %vm405_vm2, %v2705_v45, 0.0  ;;  %v645_v57 = vpop.xlane.xlu1 %644 }
 0x31d   :  { %2380 = vpow2.f32 %v691_v47  ;;  %722 = vadd.xlane.f32.xlu1 %v721_v49  ;;  %v667_v59 = vsub.f32 %v2655_v48, %v645_v57 }
 0x31f   :  { %v2709_v43 = vpop.eup %2374  ;;  %v695_v62 = vmul.f32 1.442695, %v667_v59 }
 0x320   :  { %v730_v51 = vsel %vm405_vm2, %v2709_v43, 0.0  ;;  %v2713_v52 = vpop.eup %2376  ;;  %v651_v60 = vpop.xlane.xlu1 %650 }
 0x321   :  { %731 = vadd.xlane.f32.xlu0 %v730_v51  ;;  %v736_v54 = vsel %vm405_vm2, %v2713_v52, 0.0  ;;  %v669_v63 = vsub.f32 %v2659_v50, %v651_v60  ;;  %2382 = vpow2.f32 %v695_v62 }
 0x322   :  { %2384 = vpow2.f32 %v697_v5 }
 0x323   :  { %v2715_v53 = vpop.eup %2378  ;;  %v699_v7 = vmul.f32 1.442695, %v669_v63 }
 0x324   :  { %v727_v46 = vsel %vm405_vm2, %v2715_v53, 0.0 }
 0x325   :  { %728 = vadd.xlane.f32.xlu1 %v727_v46  ;;  %737 = vadd.xlane.f32.xlu0 %v736_v54  ;;  %2386 = vpow2.f32 %v699_v7 }
 0x327   :  { %v2721_v55 = vpop.eup %2380 }
 0x328   :  { %v733_v56 = vsel %vm405_vm2, %v2721_v55, 0.0 }
 0x329   :  { %734 = vadd.xlane.f32.xlu0 %v733_v56 }
 0x336   :  { %2349 = vrot.lane.b32.xlu1 %v2573_v31, %s2502_s10  ;;  %v701_v31 = vmul.f32 1.442695, %v670_v2 }
 0x338   :  { %2388 = vpow2.f32 %v701_v31 }
 0x33f   :  { %2354 = vrot.lane.b32.xlu0 %v2577_v36, %s2502_s10  ;;  %v2733_v36 = vpop.eup %2382 }
 0x340   :  { %v2735_v8 = vpop.eup %2384  ;;  %v739_v34 = vsel %vm405_vm2, %v2733_v36, 0.0 }
 0x341   :  { %v2739_v48 = vpop.eup %2386  ;;  %v742_v41 = vsel %vm405_vm2, %v2735_v8, 0.0 }
 0x342   :  { %v745_v50 = vsel %vm405_vm2, %v2739_v48, 0.0  ;;  %v2745_v4 = vpop.eup %2388 }
 0x343   :  { %v748_v9 = vsel %vm405_vm2, %v2745_v4, 0.0 }
 0x35a   :  { %740 = vadd.xlane.f32.xlu1 %v739_v34 }
 0x35e   :  { %746 = vadd.xlane.f32.xlu1 %v745_v50  ;;  %743 = vadd.xlane.f32.xlu0 %v742_v41 }
 0x362   :  { %749 = vadd.xlane.f32.xlu1 %v748_v9 }
 0x392   :  { %v708_v11 = vpop.xlane.xlu0 %707 }
 0x396   :  { %v705_v12 = vpop.xlane.xlu1 %704 }
 0x397   :  { %2390 = vrcp.f32 %v705_v12 }
 0x398   :  { %2392 = vrcp.f32 %v708_v11 }
 0x39a   :  { %v714_v13 = vpop.xlane.xlu0 %713  ;;  %v711_v15 = vpop.xlane.xlu1 %710 }
 0x39e   :  { %v720_v17 = vpop.xlane.xlu0 %719 }
 0x39f   :  { %2394 = vrcp.f32 %v720_v17 }
 0x3a1   :  { %v2391_v18 = vpop.eup %2390 }
 0x3a2   :  { %v717_v19 = vpop.xlane.xlu1 %716  ;;  %v767_v20 = vmul.f32 %v2391_v18, %v2675_v10  ;;  %v2393_v22 = vpop.eup %2392 }
 0x3a3   :  { %2396 = vrcp.f32 %v717_v19  ;;  %v768_v25 = vmul.f32 %v2393_v22, %v2670_v6  ;;  %v1056_v22 = vld [vmem:[#allocation5 + $0x70] sm:$0xff] }
 0x3a4   :  { %2041 = vmatprep.mubr.msk.f32.mxu1 %vm405_vm2, %v767_v20  ;;  %2398 = vrcp.f32 %v714_v13 }
 0x3a6   :  { %v726_v21 = vpop.xlane.xlu0 %725 }
 0x3a7   :  { %2400 = vrcp.f32 %v726_v21 }
 0x3a8   :  { %2402 = vrcp.f32 %v711_v15 }
 0x3a9   :  { %v2395_v24 = vpop.eup %2394 }
 0x3aa   :  { %v723_v26 = vpop.xlane.xlu1 %722  ;;  %v772_v28 = vmul.f32 %v2395_v24, %v2689_v23  ;;  %v1057_v24 = vld [vmem:[#allocation5 + $0x78] sm:$0xff] }
 0x3ab   :  { %2404 = vrcp.f32 %v723_v26 }
 0x3ac   :  { %v1019_v30 = vadd.f32 %v772_v28, %v768_v25 }
 0x3ad   :  { %v2397_v33 = vpop.eup %2396 }
 0x3ae   :  { %v732_v35 = vpop.xlane.xlu0 %731  ;;  %v771_v10 = vmul.f32 %v2397_v33, %v2695_v32  ;;  %v2399_v29 = vpop.eup %2398 }
 0x3af   :  { %2406 = vrcp.f32 %v732_v35  ;;  %v770_v37 = vmul.f32 %v2399_v29, %v2682_v16  ;;  %v1832_v35 = vld [vmem:[#allocation5 + $0x4c] ss:$0 sm:$0xff] }
 0x3b0   :  { %v1018_v38 = vadd.f32 %v771_v10, %v767_v20 }
 0x3b1   :  { %v2401_v27 = vpop.eup %2400 }
 0x3b2   :  { %v729_v40 = vpop.xlane.xlu1 %728  ;;  %v738_v42 = vpop.xlane.xlu0 %737  ;;  %v774_v44 = vmul.f32 %v2401_v27, %v2700_v39 }
 0x3b3   :  { %v2403_v6 = vpop.eup %2402  ;;  %2408 = vrcp.f32 %v729_v40 }
 0x3b4   :  { %2410 = vrcp.f32 %v738_v42  ;;  %v1021_v23 = vadd.f32 %v774_v44, %v770_v37  ;;  %v769_v46 = vmul.f32 %v2403_v6, %v2679_v14 }
 0x3b5   :  { %v2405_v47 = vpop.eup %2404 }
 0x3b6   :  { %v2350_v49 = vpop.permute.xlu1 %2349  ;;  %v735_v51 = vpop.xlane.xlu0 %734  ;;  %v773_v32 = vmul.f32 %v2405_v47, %v2705_v45 }
 0x3b7   :  { %v2352_v54 = vunpack.i.h.bf16 %v2350_v49  ;;  %v2351_v56 = vunpack.i.l.bf16 %v2350_v49  ;;  %2412 = vrcp.f32 %v735_v51 }
 0x3b8   :  { %v1020_v57 = vadd.f32 %v773_v32, %v769_v46 }
 0x3b9   :  { %v2407_v58 = vpop.eup %2406  ;;  %v2231_v59 = vpack.c.bf16 %v2352_v54, %v2351_v56  ;;  %v1834_v54 = vld [vmem:[#allocation5 + $0x4e] ss:$0 sm:$0xff] }
 0x3ba   :  { %v2355_v16 = vpop.permute.xlu0 %2354  ;;  %v776_v39 = vmul.f32 %v2407_v58, %v2709_v43 }
 0x3bb   :  { %v2357_v60 = vunpack.i.h.bf16 %v2355_v16  ;;  %v2356_v61 = vunpack.i.l.bf16 %v2355_v16  ;;  %2232 = vmatprep.subr.bf16.mxu1 %v2231_v59 }
 0x3bc   :  { %2234 = vmatpush3.bf16.msra.mxu1 %v2231_v59  ;;  %v1036_v62 = vadd.f32 %v1019_v30, %v776_v39 }
 0x3bd   :  { %v2409_v63 = vpop.eup %2408  ;;  %v2235_v3 = vpack.c.bf16 %v2357_v60, %v2356_v61 }
 0x3be   :  { %v2411_v5 = vpop.eup %2410  ;;  %v775_v14 = vmul.f32 %v2409_v63, %v2715_v53 }
 0x3bf   :  { %2236 = vmatprep.subr.bf16.mxu1 %v2235_v3  ;;  %v778_v45 = vmul.f32 %v2411_v5, %v2713_v52 }
 0x3c0   :  { %2238 = vmatpush3.bf16.msra.mxu1 %v2235_v3  ;;  %v1035_v2 = vadd.f32 %v1018_v38, %v775_v14 }
 0x3c1   :  { %v2413_v7 = vpop.eup %2412  ;;  %v1038_v31 = vadd.f32 %v1021_v23, %v778_v45 }
 0x3c2   :  { %v777_v34 = vmul.f32 %v2413_v7, %v2721_v55 }
 0x3c3   :  { %2042 = vmatmul.mubr.msk.f32.vlgmr.msra.gmra.mrb[6].mxu1 %vm405_vm2, %v768_v25  ;;  %v1059_v25 = vld [vmem:[#allocation5 + $0x88] sm:$0xff] }
 0x3c4   :  { %2044 = vmatprep.mubr.msk.f32.mxu1 %vm405_vm2, %v769_v46  ;;  %v1037_v43 = vadd.f32 %v1020_v57, %v777_v34 }
 0x3c7   :  { %2045 = vmatmul.mubr.msk.f32.gmra.mrb[8].mxu1 %vm405_vm2, %v770_v37 }
 0x3c8   :  { %2047 = vmatprep.mubr.msk.f32.mxu1 %vm405_vm2, %v771_v10  ;;  %v1833_v10 = vld [vmem:[#allocation5 + $0x4d] ss:$0 sm:$0xff] }
 0x3cb   :  { %2048 = vmatmul.mubr.msk.f32.gmra.mrb[10].mxu1 %vm405_vm2, %v772_v28 }
 0x3cc   :  { %2050 = vmatprep.mubr.msk.f32.mxu1 %vm405_vm2, %v773_v32 }
 0x3cf   :  { %2051 = vmatmul.mubr.msk.f32.gmra.mrb[12].mxu1 %vm405_vm2, %v774_v44 }
 0x3d0   :  { %2053 = vmatprep.mubr.msk.f32.mxu1 %vm405_vm2, %v775_v14 }
 0x3d3   :  { %2054 = vmatmul.mubr.msk.f32.gmra.mrb[14].mxu1 %vm405_vm2, %v776_v39 }
 0x3d4   :  { %2056 = vmatprep.mubr.msk.f32.mxu1 %vm405_vm2, %v777_v34 }
 0x3d7   :  { %2057 = vmatmul.mubr.msk.f32.gmra.mrb[16].mxu1 %vm405_vm2, %v778_v45 }
 0x3e7   :  { %v741_v52 = vpop.xlane.xlu1 %740 }
 0x3e8   :  { %2414 = vrcp.f32 %v741_v52 }
 0x3eb   :  { %v747_v53 = vpop.xlane.xlu1 %746  ;;  %v744_v55 = vpop.xlane.xlu0 %743 }
 0x3ec   :  { %2416 = vrcp.f32 %v747_v53 }
 0x3ed   :  { %2418 = vrcp.f32 %v744_v55 }
 0x3ef   :  { %v750_v50 = vpop.xlane.xlu1 %749 }
 0x3f0   :  { %2420 = vrcp.f32 %v750_v50 }
 0x3f2   :  { %v2415_v41 = vpop.eup %2414 }
 0x3f3   :  { %v779_v9 = vmul.f32 %v2415_v41, %v2733_v36 }
 0x3f5   :  { %2059 = vmatprep.mubr.msk.f32.mxu1 %vm405_vm2, %v779_v9  ;;  %v2775_v11 = vadd.f32 %v1035_v2, %v779_v9  ;;  %v1835_v2 = vld [vmem:[#allocation5 + $0x4f] ss:$0 sm:$0xff] }
 0x3f6   :  { %v2417_v12 = vpop.eup %2416 }
 0x3f7   :  { %v2419_v13 = vpop.eup %2418  ;;  %v781_v15 = vmul.f32 %v2417_v12, %v2739_v48  ;;  %v2239_v48 = vpack.c.bf16 %v1057_v24, %v1056_v22 }
 0x3f8   :  { %v780_v17 = vmul.f32 %v2419_v13, %v2735_v8  ;;  %v1058_v8 = vld [vmem:[#allocation5 + $0x80] sm:$0xff] }
 0x3f9   :  { %v2779_v18 = vadd.f32 %v1037_v43, %v781_v15  ;;  %2240 = vmatprep.subr.bf16.mxu1 %v2239_v48  ;;  %v2243_v26 = vpack.c.bf16 %v1059_v25, %v1058_v8 }
 0x3fa   :  { %v2421_v19 = vpop.eup %2420  ;;  %2060 = vmatmul.mubr.msk.f32.gmra.mrb[18].mxu1 %vm405_vm2, %v780_v17  ;;  %v2782_v20 = vadd.f32 %v1036_v62, %v780_v17 }
 0x3fb   :  { %2062 = vmatprep.mubr.msk.f32.mxu1 %vm405_vm2, %v781_v15  ;;  %v782_v36 = vmul.f32 %v2421_v19, %v2745_v4  ;;  %2242 = vmatpush3.bf16.msra.mxu1 %v2239_v48  ;;  %v1836_v15 = vld [vmem:[#allocation5 + $0x90] ss:$0 sm:$0xff] }
 0x3fc   :  { %2244 = vmatprep.subr.bf16.mxu1 %v2243_v26 }
 0x3fd   :  { %v2786_v21 = vadd.f32 %v1038_v31, %v782_v36 }
 0x3fe   :  { %2063 = vmatmul.mubr.msk.f32.gmra.mrb[20].mxu1 %vm405_vm2, %v782_v36 }
 0x3ff   :  { %2246 = vmatpush3.bf16.msra.mxu1 %v2243_v26 }
 0x400   :  { %2253 = vmatprep.subr.bf16.mxu1 %v2498_v0 }
 0x496   :  { %v2043_v28 = vpop.f32.mrb[6].mxu1 }
 0x497   :  { %v909_v30 = vpop.f32.mrb[7].mxu1  ;;  %v994_v38 = vmul.f32 %v2043_v28, %v1832_v35 }
 0x498   :  { %v993_v42 = vmul.f32 %v1832_v35, %v909_v30  ;;  %v1236_v30 = vld [vmem:[#allocation5 + $0xa0] sm:$0xff] }
 0x49a   :  { %v2046_v33 = vpop.f32.mrb[8].mxu1 }
 0x49b   :  { %v919_v4 = vpop.f32.mrb[9].mxu1  ;;  %v996_v47 = vmul.f32 %v2046_v33, %v1832_v35  ;;  %v1162_v33 = vld [vmem:[#allocation5 + $0x98] sm:$0xff] }
 0x49c   :  { %v995_v46 = vmul.f32 %v1832_v35, %v919_v4  ;;  %v1310_v4 = vld [vmem:[#allocation5 + $0xa8] sm:$0xff]  ;;  %v1384_v35 = vld [vmem:[#allocation5 + $0xb0] sm:$0xff] }
 0x49e   :  { %v2049_v29 = vpop.f32.mrb[10].mxu1 }
 0x49f   :  { %v1011_v27 = vmul.f32 %v2049_v29, %v1833_v10  ;;  %v929_v40 = vpop.f32.mrb[11].mxu1  ;;  %v1476_v29 = vld [vmem:[#allocation5 + $0xc0] sm:$0xff] }
 0x4a0   :  { %v1010_v37 = vmul.f32 %v1833_v10, %v929_v40  ;;  %v1568_v40 = vld [vmem:[#allocation5 + $0x140] sm:$0xff] }
 0x4a1   :  { %v1015_v44 = vadd.f32 %v1011_v27, %v994_v38  ;;  %v1567_v38 = vld [vmem:[#allocation5 + $0x138] sm:$0xff] }
 0x4a2   :  { %v1014_v6 = vadd.f32 %v1010_v37, %v993_v42  ;;  %v2052_v23 = vpop.f32.mrb[12].mxu1  ;;  %v1477_v42 = vld [vmem:[#allocation5 + $0xc8] sm:$0xff]  ;;  %v1478_v37 = vld [vmem:[#allocation5 + $0xd0] sm:$0xff] }
 0x4a3   :  { %v1013_v49 = vmul.f32 %v2052_v23, %v1833_v10  ;;  %v939_v51 = vpop.f32.mrb[13].mxu1  ;;  %v1570_v23 = vld [vmem:[#allocation5 + $0x150] sm:$0xff] }
 0x4a4   :  { %v1012_v32 = vmul.f32 %v1833_v10, %v939_v51  ;;  %v1475_v10 = vld [vmem:[#allocation5 + $0xb8] sm:$0xff] }
 0x4a5   :  { %v1017_v56 = vadd.f32 %v1013_v49, %v996_v47  ;;  %v2272_v27 = vpack.c.bf16 %v1476_v29, %v1475_v10  ;;  %v2275_v47 = vpack.c.bf16 %v1478_v37, %v1477_v42  ;;  %v1479_v51 = vld [vmem:[#allocation5 + $0xd8] sm:$0xff]  ;;  %v1661_v10 = vld [vmem:[#allocation5 + $0x1d0] sm:$0xff] }
 0x4a6   :  { %v1016_v57 = vadd.f32 %v1012_v32, %v995_v46  ;;  %v2055_v58 = vpop.f32.mrb[14].mxu1  ;;  %v1480_v46 = vld [vmem:[#allocation5 + $0xe0] sm:$0xff]  ;;  %v1662_v29 = vld [vmem:[#allocation5 + $0x1d8] sm:$0xff] }
 0x4a7   :  { %v1028_v59 = vmul.f32 %v2055_v58, %v1834_v54  ;;  %v949_v16 = vpop.f32.mrb[15].mxu1  ;;  %v1572_v32 = vld [vmem:[#allocation5 + $0x160] sm:$0xff]  ;;  %v1482_v58 = vld [vmem:[#allocation5 + $0xf0] sm:$0xff]  ;;  %v2323_v37 = vpack.c.bf16 %v1662_v29, %v1661_v10 }
 0x4a8   :  { %v1027_v39 = vmul.f32 %v1834_v54, %v949_v16  ;;  %v1574_v16 = vld [vmem:[#allocation5 + $0x170] sm:$0xff] }
 0x4a9   :  { %v1032_v60 = vadd.f32 %v1028_v59, %v1015_v44  ;;  %v2296_v44 = vpack.c.bf16 %v1568_v40, %v1567_v38  ;;  %v1573_v59 = vld [vmem:[#allocation5 + $0x168] sm:$0xff] }
 0x4aa   :  { %v1031_v61 = vadd.f32 %v1027_v39, %v1014_v6  ;;  %v2058_v62 = vpop.f32.mrb[16].mxu1  ;;  %v1569_v6 = vld [vmem:[#allocation5 + $0x148] sm:$0xff] }
 0x4ab   :  { %v1030_v63 = vmul.f32 %v2058_v62, %v1834_v54  ;;  %v959_v3 = vpop.f32.mrb[17].mxu1  ;;  %v2299_v49 = vpack.c.bf16 %v1570_v23, %v1569_v6  ;;  %v1484_v62 = vld [vmem:[#allocation5 + $0x100] sm:$0xff]  ;;  %v1845_v6 = vld [vmem:[#allocation5 + $0x1b8] ss:$0 sm:$0xff]  ;;  %v1846_v23 = vld [vmem:[#allocation5 + $0x1b9] ss:$0 sm:$0xff] }
 0x4ac   :  { %v1029_v5 = vmul.f32 %v1834_v54, %v959_v3  ;;  %v2278_v54 = vpack.c.bf16 %v1480_v46, %v1479_v51  ;;  %v1576_v3 = vld [vmem:[#allocation5 + $0x180] sm:$0xff] }
 0x4ad   :  { %v1034_v14 = vadd.f32 %v1030_v63, %v1017_v56  ;;  %v1575_v63 = vld [vmem:[#allocation5 + $0x178] sm:$0xff] }
 0x4ae   :  { %v1033_v45 = vadd.f32 %v1029_v5, %v1016_v57  ;;  %v1481_v57 = vld [vmem:[#allocation5 + $0xe8] sm:$0xff] }
 0x4af   :  { %v2281_v39 = vpack.c.bf16 %v1482_v58, %v1481_v57 }
 0x4cd   :  { %v2061_v7 = vpop.f32.mrb[18].mxu1 }
 0x4ce   :  { %v1045_v31 = vmul.f32 %v2061_v7, %v1835_v2  ;;  %v969_v34 = vpop.f32.mrb[19].mxu1  ;;  %v1577_v7 = vld [vmem:[#allocation5 + $0x188] sm:$0xff] }
 0x4cf   :  { %v1044_v43 = vmul.f32 %v1835_v2, %v969_v34 }
 0x4d0   :  { %v1049_v52 = vadd.f32 %v1045_v31, %v1032_v60  ;;  %v2305_v60 = vpack.c.bf16 %v1574_v16, %v1573_v59  ;;  %v1578_v31 = vld [vmem:[#allocation5 + $0x190] sm:$0xff] }
 0x4d1   :  { %v1048_v53 = vadd.f32 %v1044_v43, %v1031_v61  ;;  %v2064_v55 = vpop.f32.mrb[20].mxu1  ;;  %v1483_v61 = vld [vmem:[#allocation5 + $0xf8] sm:$0xff]  ;;  %v2311_v43 = vpack.c.bf16 %v1578_v31, %v1577_v7 }
 0x4d2   :  { %v1047_v50 = vmul.f32 %v2064_v55, %v1835_v2  ;;  %v979_v41 = vpop.f32.mrb[21].mxu1  ;;  %v2284_v5 = vpack.c.bf16 %v1484_v62, %v1483_v61 }
 0x4d3   :  { %v1046_v9 = vmul.f32 %v1835_v2, %v979_v41  ;;  %2073 = vmatprep.mubr.msk.f32.mxu1 %vm405_vm2, %v1048_v53  ;;  %v1486_v2 = vld [vmem:[#allocation5 + $0x110] sm:$0xff]  ;;  %v1488_v53 = vld [vmem:[#allocation5 + $0x120] sm:$0xff] }
 0x4d4   :  { %v1051_v12 = vadd.f32 %v1047_v50, %v1034_v14  ;;  %2074 = vmatmul.mubr.msk.f32.vlgmr.msra.gmra.mrb[22].mxu1 %vm405_vm2, %v1049_v52  ;;  %v2308_v14 = vpack.c.bf16 %v1576_v3, %v1575_v63  ;;  %v1487_v52 = vld [vmem:[#allocation5 + $0x118] sm:$0xff]  ;;  %v1580_v41 = vld [vmem:[#allocation5 + $0x1a0] sm:$0xff] }
 0x4d5   :  { %v1050_v13 = vadd.f32 %v1046_v9, %v1033_v45  ;;  %v1485_v45 = vld [vmem:[#allocation5 + $0x108] sm:$0xff]  ;;  %v2290_v55 = vpack.c.bf16 %v1488_v53, %v1487_v52  ;;  %v1579_v50 = vld [vmem:[#allocation5 + $0x198] sm:$0xff] }
 0x4d6   :  { %v2287_v34 = vpack.c.bf16 %v1486_v2, %v1485_v45  ;;  %v1489_v9 = vld [vmem:[#allocation5 + $0x128] sm:$0xff] }
 0x4d7   :  { %2076 = vmatprep.mubr.msk.f32.mxu1 %vm405_vm2, %v1050_v13  ;;  %v1490_v13 = vld [vmem:[#allocation5 + $0x130] sm:$0xff] }
 0x4d8   :  { %2077 = vmatmul.mubr.msk.f32.gmra.mrb[24].mxu1 %vm405_vm2, %v1051_v12  ;;  %v2314_v12 = vpack.c.bf16 %v1580_v41, %v1579_v50 }
 0x4d9   :  { %2098 = vmatprep.mubr.msk.f32.mxu1 %vm2499_vm0, %v2500_v1 }
 0x5a7   :  { %v2075_v17 = vpop.f32.mrb[22].mxu1 }
 0x5a8   :  { %v1149_v19 = vadd.f32 %v2075_v17, %v1836_v15  ;;  %v1143_v36 = vpop.f32.mrb[23].mxu1  ;;  %v1582_v17 = vld [vmem:[#allocation5 + $0x1b0] sm:$0xff] }
 0x5a9   :  { %v1144_v22 = vadd.f32 %v1836_v15, %v1143_v36 }
 0x5ab   :  { %v2248_v24 = vpack.c.bf16 %v1149_v19, %v1144_v22  ;;  %v2078_v48 = vpop.f32.mrb[24].mxu1  ;;  %v2293_v19 = vpack.c.bf16 %v1490_v13, %v1489_v9  ;;  %v1659_v22 = vld [vmem:[#allocation5 + $0x1c0] sm:$0xff] }
 0x5ac   :  { %v1159_v8 = vadd.f32 %v2078_v48, %v1836_v15  ;;  %v1153_v25 = vpop.f32.mrb[25].mxu1 }
 0x5ad   :  { %v1154_v26 = vadd.f32 %v1836_v15, %v1153_v25  ;;  %2249 = vmatpush3.bf16.msra.mxu0 %v2248_v24  ;;  %2255 = vmatpush3.bf16.msra.mxu1 %v2248_v24  ;;  %v1581_v15 = vld [vmem:[#allocation5 + $0x1a8] sm:$0xff] }
 0x5ae   :  { %2250 = vmatprep.subr.bf16.mxu0 %v2498_v0  ;;  %2256 = vmatprep.subr.bf16.mxu1 %v2498_v0  ;;  %v2317_v36 = vpack.c.bf16 %v1582_v17, %v1581_v15 }
 0x5af   :  { %v2251_v28 = vpack.c.bf16 %v1159_v8, %v1154_v26 }
 0x5b1   :  { %2252 = vmatpush3.bf16.msra.mxu0 %v2251_v28  ;;  %2258 = vmatpush3.bf16.msra.mxu1 %v2251_v28 }
 0x5b2   :  { %2259 = vmatprep.subr.bf16.mxu0 %v2498_v0  ;;  %2265 = vmatprep.subr.bf16.mxu1 %v2498_v0 }
 0x5b4   :  { %2099 = vmatmul.mubr.msk.f32.vlgmr.msra.gmra.mrb[26].mxu1 %vm405_vm2, %v1236_v30  ;;  %2088 = vmatmul.mubr.msk.f32.vlgmr.msra.gmra.mrb[18].mxu0 %vm405_vm2, %v1162_v33 }
 0x5b5   :  { %2261 = vmatpush3.bf16.msra.mxu0 %v2248_v24  ;;  %2267 = vmatpush3.bf16.msra.mxu1 %v2248_v24  ;;  %v1660_v24 = vld [vmem:[#allocation5 + $0x1c8] sm:$0xff] }
 0x5b6   :  { %2262 = vmatprep.subr.bf16.mxu0 %v2498_v0  ;;  %2268 = vmatprep.subr.bf16.mxu1 %v2498_v0  ;;  %v2319_v48 = vpack.c.bf16 %v1660_v24, %v1659_v22 }
 0x5b7   :  { %2109 = vmatprep.mubr.msk.f32.mxu0 %vm2499_vm0, %v2500_v1  ;;  %2120 = vmatprep.mubr.msk.f32.mxu1 %vm2499_vm0, %v2500_v1 }
 0x5b9   :  { %2264 = vmatpush3.bf16.msra.mxu0 %v2251_v28  ;;  %2270 = vmatpush3.bf16.msra.mxu1 %v2251_v28 }
 0x5ba   :  { %2271 = vmatprep.subr.bf16.mxu0 %v2498_v0  ;;  %2295 = vmatprep.subr.bf16.mxu1 %v2498_v0 }
 0x5bc   :  { %2110 = vmatmul.mubr.msk.f32.vlgmr.msra.gmra.mrb[20].mxu0 %vm405_vm2, %v1310_v4  ;;  %2121 = vmatmul.mubr.msk.f32.vlgmr.msra.gmra.mrb[28].mxu1 %vm405_vm2, %v1384_v35 }
 0x5bd   :  { %2155 = vmatprep.mubr.msk.f32.mxu0 %vm2499_vm0, %v2500_v1  ;;  %2190 = vmatprep.mubr.msk.f32.mxu1 %vm2499_vm0, %v2500_v1  ;;  %v1571_v1 = vld [vmem:[#allocation5 + $0x158] sm:$0xff] }
 0x5be   :  { %2273 = vmatpush3.bf16.msra.mxu0 %v2272_v27  ;;  %2297 = vmatpush3.bf16.msra.mxu1 %v2296_v44  ;;  %v2302_v56 = vpack.c.bf16 %v1572_v32, %v1571_v1 }
 0x5bf   :  { %2274 = vmatprep.subr.bf16.mxu0 %v2498_v0  ;;  %2298 = vmatprep.subr.bf16.mxu1 %v2498_v0 }
 0x5c2   :  { %2276 = vmatpush3.bf16.msra.mxu0 %v2275_v47  ;;  %2300 = vmatpush3.bf16.msra.mxu1 %v2299_v49 }
 0x5c3   :  { %2277 = vmatprep.subr.bf16.mxu0 %v2498_v0  ;;  %2301 = vmatprep.subr.bf16.mxu1 %v2498_v0 }
 0x5c6   :  { %2279 = vmatpush3.bf16.msra.mxu0 %v2278_v54  ;;  %2303 = vmatpush3.bf16.msra.mxu1 %v2302_v56 }
 0x5c7   :  { %2280 = vmatprep.subr.bf16.mxu0 %v2498_v0  ;;  %2304 = vmatprep.subr.bf16.mxu1 %v2498_v0 }
 0x5ca   :  { %2282 = vmatpush3.bf16.msra.mxu0 %v2281_v39  ;;  %2306 = vmatpush3.bf16.msra.mxu1 %v2305_v60 }
 0x5cb   :  { %2283 = vmatprep.subr.bf16.mxu0 %v2498_v0  ;;  %2307 = vmatprep.subr.bf16.mxu1 %v2498_v0 }
 0x5ce   :  { %2285 = vmatpush3.bf16.msra.mxu0 %v2284_v5  ;;  %2309 = vmatpush3.bf16.msra.mxu1 %v2308_v14 }
 0x5cf   :  { %2286 = vmatprep.subr.bf16.mxu0 %v2498_v0  ;;  %2310 = vmatprep.subr.bf16.mxu1 %v2498_v0 }
 0x5d2   :  { %2288 = vmatpush3.bf16.msra.mxu0 %v2287_v34  ;;  %2312 = vmatpush3.bf16.msra.mxu1 %v2311_v43 }
 0x5d3   :  { %2289 = vmatprep.subr.bf16.mxu0 %v2498_v0  ;;  %2313 = vmatprep.subr.bf16.mxu1 %v2498_v0 }
 0x5d6   :  { %2291 = vmatpush3.bf16.msra.mxu0 %v2290_v55  ;;  %2315 = vmatpush3.bf16.msra.mxu1 %v2314_v12 }
 0x5d7   :  { %2292 = vmatprep.subr.bf16.mxu0 %v2498_v0  ;;  %2316 = vmatprep.subr.bf16.mxu1 %v2498_v0 }
 0x5da   :  { %2294 = vmatpush3.bf16.msra.mxu0 %v2293_v19  ;;  %2318 = vmatpush3.bf16.msra.mxu1 %v2317_v36 }
 0x5db   :  { %2320 = vmatprep.subr.bf16.mxu0 %v2319_v48 }
 0x687   :  { %v1306_v8 = vpop.f32.mrb[26].mxu1  ;;  %v1232_v25 = vpop.f32.mrb[18].mxu0 }
 0x688   :  { %1459 = vrot.lane.b32.xlu1 %v1306_v8, %s2503_s11  ;;  %v2089_v26 = vpop.f32.mrb[19].mxu0  ;;  %v2100_v28 = vpop.f32.mrb[27].mxu1 }
 0x68f   :  { %v1380_v30 = vpop.f32.mrb[20].mxu0  ;;  %v1454_v33 = vpop.f32.mrb[28].mxu1 }
 0x690   :  { %1463 = vrot.lane.b32.xlu0 %v1380_v30, %s2502_s10  ;;  %1467 = vrot.lane.b32.xlu1 %v1454_v33, %s2501_s1  ;;  %v2111_v4 = vpop.f32.mrb[21].mxu0  ;;  %v2122_v0 = vpop.f32.mrb[29].mxu1 }
 0x6fa   :  { %v1460_v35 = vpop.permute.xlu1 %1459 }
 0x6fb   :  { %v1470_v38 = vsel %vm405_vm2, %v1232_v25, %v1460_v35 }
 0x702   :  { %v1464_v27 = vpop.permute.xlu0 %1463  ;;  %v1468_v40 = vpop.permute.xlu1 %1467 }
 0x703   :  { %v1472_v42 = vsel %vm1471_vm4, %v1470_v38, %v1464_v27 }
 0x704   :  { %v1474_v44 = vsel %vm1473_vm5, %v1472_v42, %v1468_v40 }
 0x705   :  { %2156 = vmatmul.mubr.f32.vlgmr.msra.gmra.mrb[22].mxu0 %v1474_v44  ;;  %2191 = vmatmul.mubr.f32.vlgmr.msra.gmra.mrb[30].mxu1 %v1474_v44 }
 0x706   :  { %2322 = vmatpush3.bf16.msra.mxu0 %v2319_v48  ;;  %2201 = vmatprep.mubr.msk.f32.mxu0 %vm405_vm2, %v2775_v11 }
 0x707   :  { %2324 = vmatprep.subr.bf16.mxu0 %v2323_v37 }
 0x70a   :  { %2326 = vmatpush3.bf16.msra.mxu0 %v2323_v37 }
 0x70d   :  { %2202 = vmatmul.mubr.msk.f32.vlgmr.msra.gmra.mrb[24].mxu0 %vm405_vm2, %v2782_v20 }
 0x70e   :  { %2204 = vmatprep.mubr.msk.f32.mxu0 %vm405_vm2, %v2779_v18 }
 0x711   :  { %2205 = vmatmul.mubr.msk.f32.gmra.mrb[26].mxu0 %vm405_vm2, %v2786_v21 }
 0x7d8   :  { %v1562_v47 = vpop.f32.mrb[22].mxu0  ;;  %v1654_v49 = vpop.f32.mrb[30].mxu1 }
 0x7d9   :  { %v1563_v51 = vadd.f32 %v1845_v6, %v1562_v47  ;;  %v1655_v46 = vadd.f32 %v1846_v23, %v1654_v49  ;;  %v2157_v11 = vpop.f32.mrb[23].mxu0  ;;  %v2192_v1 = vpop.f32.mrb[31].mxu1 }
 0x7db   :  { %1566 = vst [vmem:[#allocation7] sm:$0xff] %v1563_v51  ;;  %1658 = vst [vmem:[#allocation7 + $0x8] sm:$0xff] %v1655_v46 }
 0x7dc   :  { %2477 = shalt.err (!%p2474_p6)
}
 0x7dd   :  { %s2478_s17 = scalar_lea.hbm %s2867_s2, 256 }
 0x7de   :  { %p2479_p7 = scmp.ne.s32.totalorder %s2867_s2, %s2478_s17  ;;  %p2482_p8 = scmp.lt.u32.totalorder %s2478_s17, %s2867_s2 }
 0x7e0   :  { %p2484_p9 = pnand %p2482_p8, %p2479_p7 }
 0x7e2   :  { %2487 = shalt.err (!%p2484_p9)
}
 0x7e3   :  { %1773 = dma.vmem_to_hbm [thread:$0]  %s1771_s13, 256, %s2867_s2, [#allocation4]   ;;  %v2203_v18 = vpop.f32.mrb[24].mxu0 }
 0x7e4   :  { %1761 = vst [vmem:[%s2868_s3 + $0x8] sm:$0xff] %v2203_v18  ;;  %v1741_v20 = vpop.f32.mrb[25].mxu0 }
 0x7e5   :  { %1760 = vst [vmem:[%s2868_s3] sm:$0xff] %v1741_v20  ;;  %v2206_v21 = vpop.f32.mrb[26].mxu0 }
 0x7e6   :  { %1763 = vst [vmem:[%s2868_s3 + $0x18] sm:$0xff] %v2206_v21  ;;  %v1751_v32 = vpop.f32.mrb[27].mxu0 }
 0x7e7   :  { %1762 = vst [vmem:[%s2868_s3 + $0x10] sm:$0xff] %v1751_v32 }
 0x7e8   :  { %2492 = dma.done.wait [#allocation4], 256  }
 0x7e9   :  { %2493 = vsyncadd [#allocation4], 4294967040 }
 0x7ea   :  { %1781 = vsyncpa [#allocation3], 1 }
 0x7eb   :  { %1782 = vsyncpa [#allocation6], 1 }
 0x7ec   :  { %1783 = vsyncpa [#allocation4], 1 }

</bundles_post_ra>
